<compile_context>
chip_gen: v6e
topology: v6e:2x2x1
jax: 0.10.0
libtpu: 0.0.40
codegen_flags: <defaults>
</compile_context>

<pallas_src>
import math

import jax
import jax.numpy as jnp
from jax import lax
from jax.experimental import pallas as pl
from jax.experimental.pallas import tpu as pltpu


_LN_EPS = 1e-5
_LANE = 128
_GROUP_CAP_FRAC = 0.35   # fraction of VMEM allowed for resident params per call
_TILE_FRAC = 0.45        # fraction of VMEM for streaming tiles + intermediates

# Resident params use a single VMEM buffer (same block index every grid step).
# Flipped off automatically if this runtime rejects pl.Buffered(1).
_SINGLE_BUFFER_PARAMS = True


# --------------------------------------------------------------------------
# small helpers
# --------------------------------------------------------------------------
def _round_up(x, mult):
    return ((x + mult - 1) // mult) * mult


def _sublane(itemsize):
    return {4: 8, 2: 16, 1: 32}.get(itemsize, 8)


def _tpu_vmem_bytes():
    try:
        return int(pltpu.get_tpu_info().vmem_capacity_bytes)
    except Exception:
        return 64 << 20          # v7x per-TensorCore VMEM: most conservative


def _normalize_act(act):
    """Map None / 'linear' to None; validate supported activations."""
    if act in (None, "linear"):
        return None
    if act in ("relu", "tanh", "sigmoid"):
        return act
    raise ValueError("Non linear function {} is not supported".format(act))


def _apply_activation(y, act):
    """Elementwise nonlinearity; pure jnp so it works in-kernel and in the ref."""
    if act is None:
        return y
    if act == "relu":
        return jnp.maximum(y, 0.0)
    if act == "tanh":
        return jnp.tanh(y)
    if act == "sigmoid":
        # exp + reciprocal live on the EUP slot; avoids a VALU divide.
        return jax.nn.sigmoid(y)
    raise ValueError("Non linear function {} is not supported".format(act))


def _masked_layernorm(y, n_true, gamma, beta):
    """LayerNorm over the TRUE feature count; padded lanes (exact zeros pre-LN)
    are masked out of the variance so padding never changes the statistics."""
    n_pad = y.shape[-1]
    inv_n = 1.0 / float(n_true)
    mean = jnp.sum(y, axis=-1, keepdims=True) * inv_n        # padded cols are 0
    centered = y - mean
    if n_pad != n_true:
        col = lax.broadcasted_iota(jnp.int32, y.shape, y.ndim - 1)
        masked = jnp.where(col < n_true, centered, 0.0)
    else:
        masked = centered
    var = jnp.sum(masked * masked, axis=-1, keepdims=True) * inv_n
    y = centered * lax.rsqrt(var + _LN_EPS)
    # padded gamma/beta are zero -> padded lanes come out exactly zero.
    return y * gamma.astype(jnp.float32) + beta.astype(jnp.float32)


# --------------------------------------------------------------------------
# fused chain kernel: act(LN(x @ W + b)) repeated, then the multi-head matmul
# --------------------------------------------------------------------------
def _make_chain_kernel(layer_cfgs, head_cfgs):
    """Build a kernel running `layer_cfgs` hidden layers back-to-back on a row
    tile, optionally followed by the fused (concatenated) head matmul.

    Ref order: x, then per hidden layer [w, b(, gamma, beta)], then (if
    head_cfgs) [w_heads, b_heads], then one output ref per head (or a single
    output ref holding the last hidden activation)."""
    n_params = sum(4 if c["use_ln"] else 2 for c in layer_cfgs)
    if head_cfgs is not None:
        n_params += 2
    n_in = 1 + n_params

    def kernel(*refs):
        out_refs = refs[n_in:]
        h = refs[0][...].astype(jnp.float32)
        p = 1
        for cfg in layer_cfgs:
            w_ref, b_ref = refs[p], refs[p + 1]
            p += 2
            y = jnp.dot(h, w_ref[...], preferred_element_type=jnp.float32)
            y = y + b_ref[...].astype(jnp.float32)
            if cfg["use_ln"]:
                g_ref, bb_ref = refs[p], refs[p + 1]
                p += 2
                y = _masked_layernorm(y, cfg["n_true"], g_ref[...], bb_ref[...])
            h = _apply_activation(y, cfg["act"])

        if head_cfgs is None:
            out_refs[0][...] = h.astype(out_refs[0].dtype)
            return

        w_ref, b_ref = refs[p], refs[p + 1]
        y = jnp.dot(h, w_ref[...], preferred_element_type=jnp.float32)
        y = y + b_ref[...].astype(jnp.float32)
        off = 0
        for idx, (n_pad, act) in enumerate(head_cfgs):
            yi = _apply_activation(y[:, off:off + n_pad], act)   # 128-aligned slice
            out_refs[idx][...] = yi.astype(out_refs[idx].dtype)
            off += n_pad

    return kernel


def _param_spec(shape, single_buffer):
    """Resident parameter: same block every grid step."""
    index_map = lambda i: (0,) * len(shape)
    if single_buffer:
        return pl.BlockSpec(shape, index_map, pipeline_mode=pl.Buffered(1))
    return pl.BlockSpec(shape, index_map)


def _pick_row_tile(m, bytes_per_row, resident_bytes, itemsize):
    """Sublane-aligned, VMEM-budgeted row tile; guarantees >=2 grid steps when
    M allows so the 'parallel' axis can shard across v7x's two TensorCores."""
    sub = _sublane(itemsize)
    if m <= sub:
        return m       # single block; block dim == full array dim is legal
    budget = int(_TILE_FRAC * _tpu_vmem_bytes()) - resident_bytes
    budget = max(budget, 2 << 20)
    tm_budget = max(sub, budget // max(bytes_per_row, 1))
    target = pl.cdiv(m, 4) if m >= 4 * sub else pl.cdiv(m, 2)
    tm = min(m, 4096, tm_budget, max(sub, target))
    return max(sub, (tm // sub) * sub)


def _run_group_impl(h2d, params, layer_cfgs, head_cfgs, dtype, single_buffer):
    m, k_pad = h2d.shape
    itemsize = jnp.dtype(dtype).itemsize

    resident = sum(int(a.size) * jnp.dtype(a.dtype).itemsize for a in params)
    resident_buffered = resident * (1 if single_buffer else 2)

    if head_cfgs is not None:
        out_widths = [n_pad for n_pad, _ in head_cfgs]
    else:
        out_widths = [layer_cfgs[-1]["n_pad"]]
    sum_out = sum(out_widths)

    widths = [k_pad] + [c["n_pad"] for c in layer_cfgs] + [sum_out]
    # double-buffered x + out tiles, plus an (over-)estimate of f32 intermediates
    per_row = 2 * itemsize * (k_pad + sum_out) + 4 * sum(widths)

    tm = _pick_row_tile(m, per_row, resident_buffered, itemsize)
    grid = (pl.cdiv(m, tm),)

    in_specs = [pl.BlockSpec((tm, k_pad), lambda i: (i, 0))]
    in_specs += [_param_spec(p.shape, single_buffer) for p in params]

    out_shapes = tuple(jax.ShapeDtypeStruct((m, w), dtype) for w in out_widths)
    out_specs = tuple(pl.BlockSpec((tm, w), lambda i: (i, 0)) for w in out_widths)

    stream = 2 * tm * itemsize * (k_pad + sum_out)
    interm = 4 * tm * sum(widths)
    needed = resident_buffered + stream + interm + (4 << 20)
    physical = _tpu_vmem_bytes()
    vmem_limit = int(min(max(needed, 48 << 20), 0.95 * physical))

    kernel = _make_chain_kernel(layer_cfgs, head_cfgs)

    return pl.pallas_call(
        kernel,
        out_shape=out_shapes,
        grid=grid,
        in_specs=in_specs,
        out_specs=out_specs,
        compiler_params=pltpu.CompilerParams(
            dimension_semantics=("parallel",),
            vmem_limit_bytes=vmem_limit),
    )(h2d, *params)


def _run_group(h2d, params, layer_cfgs, head_cfgs, dtype):
    global _SINGLE_BUFFER_PARAMS
    if _SINGLE_BUFFER_PARAMS:
        try:
            return _run_group_impl(h2d, params, layer_cfgs, head_cfgs, dtype, True)
        except Exception:
            # This runtime rejected single-buffered resident params; fall back
            # to default double-buffering (tiny params -> negligible cost).
            _SINGLE_BUFFER_PARAMS = False
    return _run_group_impl(h2d, params, layer_cfgs, head_cfgs, dtype, False)


# --------------------------------------------------------------------------
# module
# --------------------------------------------------------------------------
class MultiHeadedMLPModule:
    """JAX/Pallas equivalent of the PyTorch MultiHeadedMLPModule forward pass."""

    def __init__(self, n_heads, input_dim, output_dims, hidden_sizes,
                 hidden_nonlinearity="relu",
                 output_nonlinearities=None,
                 layer_normalization=False,
                 bias=True,
                 spectral_normalization=False,
                 spectral_coef=1.0,
                 dtype=jnp.float32,
                 key=None):
        if spectral_normalization:
            # TODO(synk): spectral_norm power-iteration weight rescaling (a
            # pre-forward weight transform with mutable u/v buffers) is not
            # implemented; the module default is off.
            raise NotImplementedError("spectral_normalization not supported")

        output_dims = self._check_for_heads("output_dims", output_dims, n_heads)
        output_nonlinearities = self._check_for_heads(
            "output_nonlinearities", output_nonlinearities, n_heads)

        self._dtype = dtype
        self._hidden_act = _normalize_act(hidden_nonlinearity)
        self._layer_norm = bool(layer_normalization)
        self._input_dim = int(input_dim)
        self._in_pad = _round_up(self._input_dim, _LANE)

        key = jax.random.PRNGKey(0) if key is None else key

        def xavier_normal(k, fan_in, fan_out):
            std = math.sqrt(2.0 / (fan_in + fan_out))
            # Stored as (in, out): transpose of the PyTorch (out, in) layout,
            # done once at init so the kernel never transposes.
            return std * jax.random.normal(k, (fan_in, fan_out), dtype)

        # Hidden layers (padded to 128 lanes once, at init).
        self._hidden = []
        prev_true, prev_pad = self._input_dim, self._in_pad
        for size in hidden_sizes:
            size = int(size)
            size_pad = _round_up(size, _LANE)
            key, wk = jax.random.split(key)
            w = xavier_normal(wk, prev_true, size)
            w_pad = jnp.zeros((prev_pad, size_pad), dtype).at[:prev_true, :size].set(w)
            layer = dict(
                w=w, b=jnp.zeros((size,), dtype),       # zeros also when bias=False
                w_pad=w_pad, b_pad=jnp.zeros((1, size_pad), dtype),
                n_true=size, n_pad=size_pad,
                gamma=None, beta=None, gamma_pad=None, beta_pad=None)
            if layer_normalization:
                layer["gamma"] = jnp.ones((size,), dtype)
                layer["beta"] = jnp.zeros((size,), dtype)
                layer["gamma_pad"] = (jnp.zeros((1, size_pad), dtype)
                                      .at[0, :size].set(1.0))
                layer["beta_pad"] = jnp.zeros((1, size_pad), dtype)
            self._hidden.append(layer)
            prev_true, prev_pad = size, size_pad

        # Output heads: fused into ONE matmul.  Each head is padded to a
        # 128-column boundary inside the concatenated weight, so the per-head
        # slices (done in-kernel) are lane-aligned and each head gets its own
        # lane-dense output ref.
        self._heads = []
        head_w_pads = []
        for i in range(n_heads):
            d = int(output_dims[i])
            d_pad = _round_up(d, _LANE)
            key, wk = jax.random.split(key)
            w = xavier_normal(wk, prev_true, d)
            w_pad = jnp.zeros((prev_pad, d_pad), dtype).at[:prev_true, :d].set(w)
            self._heads.append(dict(
                w=w, b=jnp.zeros((d,), dtype),
                act=_normalize_act(output_nonlinearities[i]),
                d=d, d_pad=d_pad))
            head_w_pads.append(w_pad)
        self._head_w_pad = jnp.concatenate(head_w_pads, axis=1)
        self._head_b_pad = jnp.zeros((1, self._head_w_pad.shape[1]), dtype)

        self._groups = self._plan_groups()

    @staticmethod
    def _check_for_heads(var_name, var, n_heads):
        if isinstance(var, (list, tuple)):
            if len(var) == 1:
                return list(var) * n_heads
            if len(var) == n_heads:
                return list(var)
            raise ValueError(
                "{} should be either a scalar or a collection of length "
                "n_heads ({}), but {} provided.".format(var_name, n_heads, var))
        return [var] * n_heads

    def _plan_groups(self):
        """Greedily pack consecutive layers into as few pallas_calls as fit the
        per-generation resident-parameter VMEM cap (normally: one call)."""
        def nbytes(arrs):
            return sum(int(a.size) * jnp.dtype(a.dtype).itemsize for a in arrs)

        cap = int(_GROUP_CAP_FRAC * _tpu_vmem_bytes())
        groups = []
        cur_params, cur_cfgs, cur_bytes = [], [], 0

        for layer in self._hidden:
            params = [layer["w_pad"], layer["b_pad"]]
            if self._layer_norm:
                params += [layer["gamma_pad"], layer["beta_pad"]]
            pbytes = 2 * nbytes(params)     # budget assumes double buffering
            # TODO(synk): a single layer whose padded weight alone exceeds the
            # VMEM cap needs a K/N-tiled accumulator kernel; not implemented.
            if cur_params and cur_bytes + pbytes > cap:
                groups.append((tuple(cur_params), tuple(cur_cfgs), None))
                cur_params, cur_cfgs, cur_bytes = [], [], 0
            cur_params += params
            cur_cfgs.append(dict(act=self._hidden_act, use_ln=self._layer_norm,
                                 n_true=layer["n_true"], n_pad=layer["n_pad"]))
            cur_bytes += pbytes

        head_params = [self._head_w_pad, self._head_b_pad]
        hbytes = 2 * nbytes(head_params)
        if cur_params and cur_bytes + hbytes > cap:
            groups.append((tuple(cur_params), tuple(cur_cfgs), None))
            cur_params, cur_cfgs = [], []
        head_cfgs = tuple((h["d_pad"], h["act"]) for h in self._heads)
        groups.append((tuple(cur_params + head_params), tuple(cur_cfgs), head_cfgs))
        return groups

    def __call__(self, input_val):
        x = jnp.asarray(input_val, dtype=self._dtype)
        leading = x.shape[:-1]
        h = x.reshape(-1, x.shape[-1])
        if h.shape[-1] != self._input_dim:
            raise ValueError("expected last dim {}, got {}".format(
                self._input_dim, h.shape[-1]))
        if self._in_pad != self._input_dim:
            h = jnp.pad(h, ((0, 0), (0, self._in_pad - self._input_dim)))

        outs_pad = None
        for params, layer_cfgs, head_cfgs in self._groups:
            res = _run_group(h, list(params), list(layer_cfgs), head_cfgs,
                             self._dtype)
            if head_cfgs is None:
                h = res[0]          # padded activation, stays lane-dense
            else:
                outs_pad = res

        outs = []
        for o, head in zip(outs_pad, self._heads):
            d = head["d"]
            outs.append(o[:, :d].reshape(*leading, d))   # lane-aligned slice
        return outs


# --------------------------------------------------------------------------
# plain-JAX reference (no Pallas) mirroring the PyTorch forward
# --------------------------------------------------------------------------
def _reference_forward(module, x):
    hp = lax.Precision.HIGHEST
    leading = x.shape[:-1]
    h = x.reshape(-1, x.shape[-1]).astype(jnp.float32)
    for layer in module._hidden:
        y = jnp.dot(h, layer["w"], precision=hp) + layer["b"]
        if layer["gamma"] is not None:
            mean = y.mean(axis=-1, keepdims=True)
            var = jnp.square(y - mean).mean(axis=-1, keepdims=True)
            y = (y - mean) / jnp.sqrt(var + _LN_EPS)
            y = y * layer["gamma"] + layer["beta"]
        h = _apply_activation(y, module._hidden_act)
    outs = []
    for head in module._heads:
        y = jnp.dot(h, head["w"], precision=hp) + head["b"]
        y = _apply_activation(y, head["act"])
        outs.append(y.reshape(*leading, y.shape[-1]))
    return outs


if __name__ == "__main__":
    key = jax.random.PRNGKey(0)
    k_x, k_p1, k_p2 = jax.random.split(key, 3)

    batch, seq, input_dim = 2, 8, 32
    hidden_sizes = (32, 32)
    n_heads = 2
    output_dims = [8, 4]

    x = jax.random.normal(k_x, (batch, seq, input_dim), dtype=jnp.float32)

    # Config 1: relu hidden, linear heads — whole network fused in one call.
    module = MultiHeadedMLPModule(
        n_heads=n_heads, input_dim=input_dim, output_dims=output_dims,
        hidden_sizes=hidden_sizes, hidden_nonlinearity="relu",
        output_nonlinearities=None, layer_normalization=False,
        bias=True, key=k_p1)

    outs = [jax.block_until_ready(o) for o in module(x)]
    refs = _reference_forward(module, x)

    assert len(outs) == n_heads
    # Tolerance covers MXU precision-mode differences between the in-kernel
    # matmul and the plain-XLA HIGHEST-precision reference matmul.
    for o, r, d in zip(outs, refs, output_dims):
        assert o.shape == (batch, seq, d) and o.dtype == x.dtype
        assert jnp.allclose(o, r, atol=2e-2, rtol=2e-2), "mismatch vs reference"

    # Config 2: layer-norm + tanh hidden, mixed per-head nonlinearities.
    module2 = MultiHeadedMLPModule(
        n_heads=2, input_dim=input_dim, output_dims=[8, 8],
        hidden_sizes=(32,), hidden_nonlinearity="tanh",
        output_nonlinearities=["tanh", None], layer_normalization=True,
        bias=True, key=k_p2)

    outs2 = [jax.block_until_ready(o) for o in module2(x)]
    refs2 = _reference_forward(module2, x)
    for o, r in zip(outs2, refs2):
        assert o.shape == (batch, seq, 8)
        assert jnp.allclose(o, r, atol=2e-2, rtol=2e-2), "mismatch (ln/tanh path)"

    print("KERNEL_OK")
</pallas_src>

<mosaic_0001>
module attributes {stable_mosaic.version = 11 : i64} {
  func.func @kernel(%arg0: i32, %arg1: memref<8x128xf32, #tpu.memory_space<vmem>>, %arg2: memref<128x128xf32, #tpu.memory_space<vmem>>, %arg3: memref<1x128xf32, #tpu.memory_space<vmem>>, %arg4: memref<128x128xf32, #tpu.memory_space<vmem>>, %arg5: memref<1x128xf32, #tpu.memory_space<vmem>>, %arg6: memref<128x256xf32, #tpu.memory_space<vmem>>, %arg7: memref<1x256xf32, #tpu.memory_space<vmem>>, %arg8: memref<8x128xf32, #tpu.memory_space<vmem>>, %arg9: memref<8x128xf32, #tpu.memory_space<vmem>>) attributes {dimension_semantics = [#tpu.dimension_semantics<parallel>], iteration_bounds = array<i64: 2>, scalar_prefetch = 0 : i64, scratch_operands = 0 : i64, tpu.core_type = #tpu.core_type<tc>, window_params = [{transform_indices = @transform_0, window_bounds = array<i64: 8, 128>}, {pipeline_mode = #tpu.pipeline_mode<synchronous>, transform_indices = @transform_1, window_bounds = array<i64: 128, 128>}, {pipeline_mode = #tpu.pipeline_mode<synchronous>, transform_indices = @transform_2, window_bounds = array<i64: 1, 128>}, {pipeline_mode = #tpu.pipeline_mode<synchronous>, transform_indices = @transform_3, window_bounds = array<i64: 128, 128>}, {pipeline_mode = #tpu.pipeline_mode<synchronous>, transform_indices = @transform_4, window_bounds = array<i64: 1, 128>}, {pipeline_mode = #tpu.pipeline_mode<synchronous>, transform_indices = @transform_5, window_bounds = array<i64: 128, 256>}, {pipeline_mode = #tpu.pipeline_mode<synchronous>, transform_indices = @transform_6, window_bounds = array<i64: 1, 256>}, {transform_indices = @transform_7, window_bounds = array<i64: 8, 128>}, {transform_indices = @transform_8, window_bounds = array<i64: 8, 128>}]} {
    %c0 = arith.constant 0 : index
    %c0_0 = arith.constant 0 : index
    %0 = vector.load %arg1[%c0, %c0_0] : memref<8x128xf32, #tpu.memory_space<vmem>>, vector<8x128xf32>
    %c0_1 = arith.constant 0 : index
    %c0_2 = arith.constant 0 : index
    %1 = vector.load %arg2[%c0_1, %c0_2] : memref<128x128xf32, #tpu.memory_space<vmem>>, vector<128x128xf32>
    %cst = arith.constant dense<0.000000e+00> : vector<8x128xf32>
    %2 = tpu.matmul %0, %1, %cst {dimension_numbers = #tpu.dot_dimension_numbers<[1], [0], [0], [1], [0, 0, 1, 1], [], []>} : vector<8x128xf32>, vector<128x128xf32>, vector<8x128xf32> -> vector<8x128xf32>
    %c0_3 = arith.constant 0 : index
    %c0_4 = arith.constant 0 : index
    %3 = vector.load %arg3[%c0_3, %c0_4] : memref<1x128xf32, #tpu.memory_space<vmem>>, vector<1x128xf32>
    %4 = vector.broadcast %3 : vector<1x128xf32> to vector<8x128xf32>
    %5 = arith.addf %2, %4 : vector<8x128xf32>
    %cst_5 = arith.constant 0.000000e+00 : f32
    %6 = vector.broadcast %cst_5 : f32 to vector<8x128xf32>
    %7 = arith.maximumf %5, %6 : vector<8x128xf32>
    %c0_6 = arith.constant 0 : index
    %c0_7 = arith.constant 0 : index
    %8 = vector.load %arg4[%c0_6, %c0_7] : memref<128x128xf32, #tpu.memory_space<vmem>>, vector<128x128xf32>
    %cst_8 = arith.constant dense<0.000000e+00> : vector<8x128xf32>
    %9 = tpu.matmul %7, %8, %cst_8 {dimension_numbers = #tpu.dot_dimension_numbers<[1], [0], [0], [1], [0, 0, 1, 1], [], []>} : vector<8x128xf32>, vector<128x128xf32>, vector<8x128xf32> -> vector<8x128xf32>
    %c0_9 = arith.constant 0 : index
    %c0_10 = arith.constant 0 : index
    %10 = vector.load %arg5[%c0_9, %c0_10] : memref<1x128xf32, #tpu.memory_space<vmem>>, vector<1x128xf32>
    %11 = vector.broadcast %10 : vector<1x128xf32> to vector<8x128xf32>
    %12 = arith.addf %9, %11 : vector<8x128xf32>
    %cst_11 = arith.constant 0.000000e+00 : f32
    %13 = vector.broadcast %cst_11 : f32 to vector<8x128xf32>
    %14 = arith.maximumf %12, %13 : vector<8x128xf32>
    %c0_12 = arith.constant 0 : index
    %c0_13 = arith.constant 0 : index
    %15 = vector.load %arg6[%c0_12, %c0_13] : memref<128x256xf32, #tpu.memory_space<vmem>>, vector<128x256xf32>
    %cst_14 = arith.constant dense<0.000000e+00> : vector<8x256xf32>
    %16 = tpu.matmul %14, %15, %cst_14 {dimension_numbers = #tpu.dot_dimension_numbers<[1], [0], [0], [1], [0, 0, 1, 1], [], []>} : vector<8x128xf32>, vector<128x256xf32>, vector<8x256xf32> -> vector<8x256xf32>
    %c0_15 = arith.constant 0 : index
    %c0_16 = arith.constant 0 : index
    %17 = vector.load %arg7[%c0_15, %c0_16] : memref<1x256xf32, #tpu.memory_space<vmem>>, vector<1x256xf32>
    %18 = vector.broadcast %17 : vector<1x256xf32> to vector<8x256xf32>
    %19 = arith.addf %16, %18 : vector<8x256xf32>
    %20 = vector.extract_strided_slice %19 {offsets = [0, 0], sizes = [8, 128], strides = [1, 1]} : vector<8x256xf32> to vector<8x128xf32>
    %c0_17 = arith.constant 0 : index
    %c0_18 = arith.constant 0 : index
    %21 = vector.load %arg8[%c0_17, %c0_18] : memref<8x128xf32, #tpu.memory_space<vmem>>, vector<8x128xf32>
    tpu.vector_store %arg8[%c0_17, %c0_18], %20 {strides = array<i32>} : memref<8x128xf32, #tpu.memory_space<vmem>>, vector<8x128xf32>,
    %22 = vector.extract_strided_slice %19 {offsets = [0, 128], sizes = [8, 128], strides = [1, 1]} : vector<8x256xf32> to vector<8x128xf32>
    %c0_19 = arith.constant 0 : index
    %c0_20 = arith.constant 0 : index
    %23 = vector.load %arg9[%c0_19, %c0_20] : memref<8x128xf32, #tpu.memory_space<vmem>>, vector<8x128xf32>
    tpu.vector_store %arg9[%c0_19, %c0_20], %22 {strides = array<i32>} : memref<8x128xf32, #tpu.memory_space<vmem>>, vector<8x128xf32>,
    return
  }
  func.func @transform_0(%arg0: i32) -> (i32, i32) {
    %c0_i32 = arith.constant 0 : i32
    %c0_i32_0 = arith.constant 0 : i32
    return %arg0, %c0_i32 : i32, i32
  }
  func.func @transform_1(%arg0: i32) -> (i32, i32) {
    %c0_i32 = arith.constant 0 : i32
    %c0_i32_0 = arith.constant 0 : i32
    %c0_i32_1 = arith.constant 0 : i32
    return %c0_i32, %c0_i32_0 : i32, i32
  }
  func.func @transform_2(%arg0: i32) -> (i32, i32) {
    %c0_i32 = arith.constant 0 : i32
    %c0_i32_0 = arith.constant 0 : i32
    %c0_i32_1 = arith.constant 0 : i32
    return %c0_i32, %c0_i32_0 : i32, i32
  }
  func.func @transform_3(%arg0: i32) -> (i32, i32) {
    %c0_i32 = arith.constant 0 : i32
    %c0_i32_0 = arith.constant 0 : i32
    %c0_i32_1 = arith.constant 0 : i32
    return %c0_i32, %c0_i32_0 : i32, i32
  }
  func.func @transform_4(%arg0: i32) -> (i32, i32) {
    %c0_i32 = arith.constant 0 : i32
    %c0_i32_0 = arith.constant 0 : i32
    %c0_i32_1 = arith.constant 0 : i32
    return %c0_i32, %c0_i32_0 : i32, i32
  }
  func.func @transform_5(%arg0: i32) -> (i32, i32) {
    %c0_i32 = arith.constant 0 : i32
    %c0_i32_0 = arith.constant 0 : i32
    %c0_i32_1 = arith.constant 0 : i32
    return %c0_i32, %c0_i32_0 : i32, i32
  }
  func.func @transform_6(%arg0: i32) -> (i32, i32) {
    %c0_i32 = arith.constant 0 : i32
    %c0_i32_0 = arith.constant 0 : i32
    %c0_i32_1 = arith.constant 0 : i32
    return %c0_i32, %c0_i32_0 : i32, i32
  }
  func.func @transform_7(%arg0: i32) -> (i32, i32) {
    %c0_i32 = arith.constant 0 : i32
    %c0_i32_0 = arith.constant 0 : i32
    return %arg0, %c0_i32 : i32, i32
  }
  func.func @transform_8(%arg0: i32) -> (i32, i32) {
    %c0_i32 = arith.constant 0 : i32
    %c0_i32_0 = arith.constant 0 : i32
    return %arg0, %c0_i32 : i32, i32
  }
}

module attributes {stable_mosaic.version = 11 : i64} {
  func.func @kernel(%arg0: i32, %arg1: memref<8x128xf32, #tpu.memory_space<vmem>>, %arg2: memref<128x128xf32, #tpu.memory_space<vmem>>, %arg3: memref<1x128xf32, #tpu.memory_space<vmem>>, %arg4: memref<128x128xf32, #tpu.memory_space<vmem>>, %arg5: memref<1x128xf32, #tpu.memory_space<vmem>>, %arg6: memref<128x256xf32, #tpu.memory_space<vmem>>, %arg7: memref<1x256xf32, #tpu.memory_space<vmem>>, %arg8: memref<8x128xf32, #tpu.memory_space<vmem>>, %arg9: memref<8x128xf32, #tpu.memory_space<vmem>>) attributes {dimension_semantics = [#tpu.dimension_semantics<parallel>], iteration_bounds = array<i64: 2>, scalar_prefetch = 0 : i64, scratch_operands = 0 : i64, tpu.core_type = #tpu.core_type<tc>, window_params = [{transform_indices = @transform_0, window_bounds = array<i64: 8, 128>}, {pipeline_mode = #tpu.pipeline_mode<synchronous>, transform_indices = @transform_1, window_bounds = array<i64: 128, 128>}, {pipeline_mode = #tpu.pipeline_mode<synchronous>, transform_indices = @transform_2, window_bounds = array<i64: 1, 128>}, {pipeline_mode = #tpu.pipeline_mode<synchronous>, transform_indices = @transform_3, window_bounds = array<i64: 128, 128>}, {pipeline_mode = #tpu.pipeline_mode<synchronous>, transform_indices = @transform_4, window_bounds = array<i64: 1, 128>}, {pipeline_mode = #tpu.pipeline_mode<synchronous>, transform_indices = @transform_5, window_bounds = array<i64: 128, 256>}, {pipeline_mode = #tpu.pipeline_mode<synchronous>, transform_indices = @transform_6, window_bounds = array<i64: 1, 256>}, {transform_indices = @transform_7, window_bounds = array<i64: 8, 128>}, {transform_indices = @transform_8, window_bounds = array<i64: 8, 128>}]} {
    %c0 = arith.constant 0 : index
    %c0_0 = arith.constant 0 : index
    %0 = vector.load %arg1[%c0, %c0_0] : memref<8x128xf32, #tpu.memory_space<vmem>>, vector<8x128xf32>
    %c0_1 = arith.constant 0 : index
    %c0_2 = arith.constant 0 : index
    %1 = vector.load %arg2[%c0_1, %c0_2] : memref<128x128xf32, #tpu.memory_space<vmem>>, vector<128x128xf32>
    %cst = arith.constant dense<0.000000e+00> : vector<8x128xf32>
    %2 = tpu.matmul %0, %1, %cst {dimension_numbers = #tpu.dot_dimension_numbers<[1], [0], [0], [1], [0, 0, 1, 1], [], []>} : vector<8x128xf32>, vector<128x128xf32>, vector<8x128xf32> -> vector<8x128xf32>
    %c0_3 = arith.constant 0 : index
    %c0_4 = arith.constant 0 : index
    %3 = vector.load %arg3[%c0_3, %c0_4] : memref<1x128xf32, #tpu.memory_space<vmem>>, vector<1x128xf32>
    %4 = vector.broadcast %3 : vector<1x128xf32> to vector<8x128xf32>
    %5 = arith.addf %2, %4 : vector<8x128xf32>
    %cst_5 = arith.constant 0.000000e+00 : f32
    %6 = vector.broadcast %cst_5 : f32 to vector<8x128xf32>
    %7 = arith.maximumf %5, %6 : vector<8x128xf32>
    %c0_6 = arith.constant 0 : index
    %c0_7 = arith.constant 0 : index
    %8 = vector.load %arg4[%c0_6, %c0_7] : memref<128x128xf32, #tpu.memory_space<vmem>>, vector<128x128xf32>
    %cst_8 = arith.constant dense<0.000000e+00> : vector<8x128xf32>
    %9 = tpu.matmul %7, %8, %cst_8 {dimension_numbers = #tpu.dot_dimension_numbers<[1], [0], [0], [1], [0, 0, 1, 1], [], []>} : vector<8x128xf32>, vector<128x128xf32>, vector<8x128xf32> -> vector<8x128xf32>
    %c0_9 = arith.constant 0 : index
    %c0_10 = arith.constant 0 : index
    %10 = vector.load %arg5[%c0_9, %c0_10] : memref<1x128xf32, #tpu.memory_space<vmem>>, vector<1x128xf32>
    %11 = vector.broadcast %10 : vector<1x128xf32> to vector<8x128xf32>
    %12 = arith.addf %9, %11 : vector<8x128xf32>
    %cst_11 = arith.constant 0.000000e+00 : f32
    %13 = vector.broadcast %cst_11 : f32 to vector<8x128xf32>
    %14 = arith.maximumf %12, %13 : vector<8x128xf32>
    %c0_12 = arith.constant 0 : index
    %c0_13 = arith.constant 0 : index
    %15 = vector.load %arg6[%c0_12, %c0_13] : memref<128x256xf32, #tpu.memory_space<vmem>>, vector<128x256xf32>
    %cst_14 = arith.constant dense<0.000000e+00> : vector<8x256xf32>
    %16 = tpu.matmul %14, %15, %cst_14 {dimension_numbers = #tpu.dot_dimension_numbers<[1], [0], [0], [1], [0, 0, 1, 1], [], []>} : vector<8x128xf32>, vector<128x256xf32>, vector<8x256xf32> -> vector<8x256xf32>
    %c0_15 = arith.constant 0 : index
    %c0_16 = arith.constant 0 : index
    %17 = vector.load %arg7[%c0_15, %c0_16] : memref<1x256xf32, #tpu.memory_space<vmem>>, vector<1x256xf32>
    %18 = vector.broadcast %17 : vector<1x256xf32> to vector<8x256xf32>
    %19 = arith.addf %16, %18 : vector<8x256xf32>
    %20 = vector.extract_strided_slice %19 {offsets = [0, 0], sizes = [8, 128], strides = [1, 1]} : vector<8x256xf32> to vector<8x128xf32>
    %c0_17 = arith.constant 0 : index
    %c0_18 = arith.constant 0 : index
    %21 = vector.load %arg8[%c0_17, %c0_18] : memref<8x128xf32, #tpu.memory_space<vmem>>, vector<8x128xf32>
    tpu.vector_store %arg8[%c0_17, %c0_18], %20 {strides = array<i32>} : memref<8x128xf32, #tpu.memory_space<vmem>>, vector<8x128xf32>,
    %22 = vector.extract_strided_slice %19 {offsets = [0, 128], sizes = [8, 128], strides = [1, 1]} : vector<8x256xf32> to vector<8x128xf32>
    %c0_19 = arith.constant 0 : index
    %c0_20 = arith.constant 0 : index
    %23 = vector.load %arg9[%c0_19, %c0_20] : memref<8x128xf32, #tpu.memory_space<vmem>>, vector<8x128xf32>
    tpu.vector_store %arg9[%c0_19, %c0_20], %22 {strides = array<i32>} : memref<8x128xf32, #tpu.memory_space<vmem>>, vector<8x128xf32>,
    return
  }
  func.func @transform_0(%arg0: i32) -> (i32, i32) {
    %c0_i32 = arith.constant 0 : i32
    %c0_i32_0 = arith.constant 0 : i32
    return %arg0, %c0_i32 : i32, i32
  }
  func.func @transform_1(%arg0: i32) -> (i32, i32) {
    %c0_i32 = arith.constant 0 : i32
    %c0_i32_0 = arith.constant 0 : i32
    %c0_i32_1 = arith.constant 0 : i32
    return %c0_i32, %c0_i32_0 : i32, i32
  }
  func.func @transform_2(%arg0: i32) -> (i32, i32) {
    %c0_i32 = arith.constant 0 : i32
    %c0_i32_0 = arith.constant 0 : i32
    %c0_i32_1 = arith.constant 0 : i32
    return %c0_i32, %c0_i32_0 : i32, i32
  }
  func.func @transform_3(%arg0: i32) -> (i32, i32) {
    %c0_i32 = arith.constant 0 : i32
    %c0_i32_0 = arith.constant 0 : i32
    %c0_i32_1 = arith.constant 0 : i32
    return %c0_i32, %c0_i32_0 : i32, i32
  }
  func.func @transform_4(%arg0: i32) -> (i32, i32) {
    %c0_i32 = arith.constant 0 : i32
    %c0_i32_0 = arith.constant 0 : i32
    %c0_i32_1 = arith.constant 0 : i32
    return %c0_i32, %c0_i32_0 : i32, i32
  }
  func.func @transform_5(%arg0: i32) -> (i32, i32) {
    %c0_i32 = arith.constant 0 : i32
    %c0_i32_0 = arith.constant 0 : i32
    %c0_i32_1 = arith.constant 0 : i32
    return %c0_i32, %c0_i32_0 : i32, i32
  }
  func.func @transform_6(%arg0: i32) -> (i32, i32) {
    %c0_i32 = arith.constant 0 : i32
    %c0_i32_0 = arith.constant 0 : i32
    %c0_i32_1 = arith.constant 0 : i32
    return %c0_i32, %c0_i32_0 : i32, i32
  }
  func.func @transform_7(%arg0: i32) -> (i32, i32) {
    %c0_i32 = arith.constant 0 : i32
    %c0_i32_0 = arith.constant 0 : i32
    return %arg0, %c0_i32 : i32, i32
  }
  func.func @transform_8(%arg0: i32) -> (i32, i32) {
    %c0_i32 = arith.constant 0 : i32
    %c0_i32_0 = arith.constant 0 : i32
    return %arg0, %c0_i32 : i32, i32
  }
}

</mosaic_0001>

<bundles_post_ra>
// kernel: tpu_custom_call.1
= control target key start
LH: loop header
LB: loop body
LE: loop exit
PB: predicated region body
PF: predicated region fallthrough
CT: control target
= control target key end

     0   :  { %s1599_s0 = inlined_call_operand.hbm [shape: f32[16,128], index: 0, kind: input, shape index: {}]   ;;  %s1600_s1 = inlined_call_operand.hbm [shape: f32[128,128], index: 1, kind: input, shape index: {}]   ;;  %s1601_s2 = inlined_call_operand.vmem [shape: f32[1,128], index: 2, kind: input, shape index: {}]   ;;  %s1602_s3 = inlined_call_operand.hbm [shape: f32[128,128], index: 3, kind: input, shape index: {}]   ;;  %s1603_s4 = inlined_call_operand.vmem [shape: f32[1,128], index: 4, kind: input, shape index: {}]   ;;  %s1604_s5 = inlined_call_operand.hbm [shape: f32[128,256], index: 5, kind: input, shape index: {}]   ;;  %s1605_s6 = inlined_call_operand.vmem [shape: f32[1,256], index: 6, kind: input, shape index: {}]   ;;  %s1606_s7 = inlined_call_operand.hbm [shape: f32[16,128], index: 7, kind: output, shape index: {0}]   ;;  %s1607_s8 = inlined_call_operand.hbm [shape: f32[16,128], index: 8, kind: output, shape index: {1}]  }
   0x1   :  { %1612 = sst [smem:[#allocation18_spill]] %s1600_s1 }
   0x2   :  { %1613 = sst [smem:[#allocation19_spill]] %s1602_s3 }
   0x3   :  { %1614 = sst [smem:[#allocation20_spill]] %s1604_s5 }
   0x4   :  { %14 = vsyncpa [#allocation3], 0 }
   0x5   :  { %16 = vsyncpa [#allocation3 + $0x1], 0 }
   0x6   :  { %17 = vsyncpa [#allocation6], 0 }
   0x7   :  { %18 = vsyncpa [#allocation9], 0 }
   0x8   :  { %19 = vsyncpa [#allocation4], 0 }
   0x9   :  { %21 = vsyncpa [#allocation4 + $0x1], 0 }
   0xa   :  { %22 = vsyncpa [#allocation12], 0 }
   0xb   :  { %24 = vsyncpa [#allocation12 + $0x1], 0  ;;  %s1327_s27 = smov 0   ;;  %s1329_s28 = smov 0  }
   0xc   :  { %s1331_s29 = smov 0   ;;  %s1333_s30 = smov 0  }
   0xd LB: > { %s1348_s9 = sadd.s32 4294967295, %s1268_s30   ;;  %s845_s10 = sadd.s32 4294967294, %s1268_s30   ;;  %s1268_s30 = sphi %s1333_s30, %s1637_s30   ;;  %s1264_s29 = sphi %s1331_s29, %s1636_s29   ;;  %s1260_s28 = sphi %s1329_s28, %s1635_s28   ;;  %s1256_s27 = sphi %s1327_s27, %s1634_s27  }
   0xe   : > { %p50_p0 = scmp.ne.s32.totalorder %s1260_s28, %s1256_s27  ;;  %p1608_p1 = scmp.eq.s32.totalorder %s1348_s9, 0 }
   0xf   : > { %p206_p3 = scmp.eq.s32.totalorder %s845_s10, 1  ;;  %p846_p5 = scmp.ge.s32.totalorder %s1268_s30, 1 }
  0x10   : > { %p1357_p4 = por %p1608_p1, %p50_p0  ;;  %p239_p7 = scmp.lt.s32.totalorder %s1268_s30, 3 }
  0x11   : > { %p1362_p6 = por %p206_p3, %p50_p0  ;;  %s1270_s14 = smov [#allocation5]  }
  0x12   : > { %s1615_s11 = scalar_select %p1357_p4, 1, 0 }
  0x13   : > { %s1616_s12 = scalar_select %p1362_p6, 1, 0 }
  0x14   : > { %p1367_p8 = pnand %p846_p5, %p239_p7  ;;  %s251_s15 = sshll.u32 %s1270_s14, 4  ;;  %s252_s15 = int_to_ptr.vmem [resolvable:$true] %s251_s15 }
  0x15   : > { %s1271_s17 = smov [#allocation7]   ;;  %s1272_s19 = smov [#allocation8]  }
  0x16   : > { %s1617_s13 = scalar_select %p1367_p8, 1, 0 }
  0x17   : > { %p990_p9 = pneg %p1367_p8  ;;  %s267_s18 = sshll.u32 %s1271_s17, 4  ;;  %s268_s18 = int_to_ptr.vmem [resolvable:$true] %s267_s18 }
  0x18   : > { %s283_s20 = sshll.u32 %s1272_s19, 4  ;;  %s1071_s21 = scalar_lea.vmem %s252_s15, 2048  ;;  %s284_s20 = int_to_ptr.vmem [resolvable:$true] %s283_s20 }
  0x19   : > { %p1376_p11 = pnand %p990_p9, %p1608_p1  ;;  %p1072_p13 = scmp.ne.s32.totalorder %s252_s15, %s1071_s21 }
  0x1a   : > { %p1079_p5 = scmp.lt.s32.totalorder %s252_s15, %s252_s15  ;;  %p1080_p7 = scmp.lt.s32.totalorder %s1071_s21, %s1071_s21 }
  0x1b   : > { %p1062_p12 = pneg %p1376_p11 }
  0x1c   : > { %p1081_p9 = por %p1080_p7, %p1079_p5 }
  0x1d   : > { %p1074_p0 = pnand %p1072_p13, %p1062_p12 }
  0x1f   : > { %p1075_p3 = pneg %p1074_p0 }
  0x21   : > { %p1082_p10 = pnand %p1081_p9, %p1075_p3 }
  0x23   : > { %1085 = shalt.err (!%p1082_p10)
}
  0x24   : > { %s1273_s22 = smov 128   ;;  %s1274_s23 = smov 8  }
  0x25   : > { %s1619_s1 = sld [smem:[#allocation18_spill]]  ;;  %s1097_s26 = scalar_lea.vmem %s268_s18, 2048 }
  0x26   : > { %p1098_p1 = scmp.ne.s32.totalorder %s268_s18, %s1097_s26  ;;  %p1105_p2 = scmp.lt.s32.totalorder %s268_s18, %s268_s18 }
  0x27   : > { %p1106_p6 = scmp.lt.s32.totalorder %s1097_s26, %s1097_s26 }
  0x28   : > { %p1100_p13 = pnand %p1098_p1, %p1062_p12 }
  0x29   : > { %p1107_p5 = por %p1106_p6, %p1105_p2 }
  0x2a   : > { %p1101_p0 = pneg %p1100_p13 }
  0x2b   : > { %993 = dma.hbm_to_vmem [thread:$0]  (!%p1376_p11), %s1619_s1, 2048, %s252_s15, [#allocation6], %s1273_s22, %s1273_s22, %s1274_s23  }
  0x2c   : > { %p1108_p3 = pnand %p1107_p5, %p1101_p0 }
  0x2e   : > { %1111 = shalt.err (!%p1108_p3)
}
  0x2f   : > { %s1620_s3 = sld [smem:[#allocation19_spill]]  ;;  %s1123_s15 = scalar_lea.vmem %s284_s20, 4096 }
  0x30   : > { %p1124_p10 = scmp.ne.s32.totalorder %s284_s20, %s1123_s15  ;;  %p1131_p9 = scmp.lt.s32.totalorder %s284_s20, %s284_s20 }
  0x31   : > { %p1132_p13 = scmp.lt.s32.totalorder %s1123_s15, %s1123_s15 }
  0x32   : > { %p1126_p7 = pnand %p1124_p10, %p1062_p12 }
  0x33   : > { %p1133_p4 = por %p1132_p13, %p1131_p9 }
  0x34   : > { %p1127_p1 = pneg %p1126_p7 }
  0x35   : > { %996 = dma.hbm_to_vmem [thread:$0]  (!%p1376_p11), %s1620_s3, 2048, %s268_s18, [#allocation6], %s1273_s22, %s1273_s22, %s1274_s23  }
  0x36   : > { %p1134_p2 = pnand %p1133_p4, %p1127_p1 }
  0x38   : > { %1137 = shalt.err (!%p1134_p2)
}
  0x39   : > { %s1275_s17 = smov 256   ;;  %s1276_s18 = smov 16  }
  0x3a   : > { %s1621_s5 = sld [smem:[#allocation20_spill]]  ;;  %s1407_s22 = sadd.s32 1, %s1268_s30  }
  0x3b   : > { %s34_s23 = ssub.s32 %s1268_s30, %s1407_s22  ;;  %s37_s24 = sadd.s32 1, %s1264_s29 }
  0x3c   : > { %p35_p4 = scmp.eq.s32.totalorder %s34_s23, 0  ;;  %p44_p6 = scmp.ne.s32.totalorder %s1264_s29, %s1260_s28 }
  0x3d   : > { %p45_p12 = scmp.eq.s32.totalorder %s1268_s30, 0  ;;  %p1014_p0 = scmp.lt.s32.totalorder %s1268_s30, 2 }
  0x3e   : > { %s1417_s25 = scalar_select %p35_p4, %s1264_s29, %s37_s24  }
  0x3f   : > { %p46_p5 = por %p45_p12, %p44_p6  ;;  %p1622_p3 = scmp.eq.s32.totalorder %s1348_s9, 1 }
  0x40   : > { %999 = dma.hbm_to_vmem [thread:$0]  (!%p1376_p11), %s1621_s5, 4096, %s284_s20, [#allocation9], %s1275_s17, %s1275_s17, %s1276_s18  }
  0x41   : > { %p1421_p10 = por %p1622_p3, %p44_p6  ;;  %s300_s16 = sand.u32 1, %s1264_s29  }
  0x42   : > { %s852_s10 = sshll.u32 %s1268_s30, 7  ;;  %s851_s20 = sshll.u32 %s300_s16, 3 }
  0x43   : > { %s1623_s26 = scalar_select %p1421_p10, 1, 0 }
  0x44   : > { %s1430_s17 = scalar_lea.hbm %s1599_s0, %s852_s10  ;;  %s304_s18 = scalar_lea.vmem [#allocation2], %s851_s20 }
  0x45   : > { %s311_s19 = sshll.u32 %s304_s18, 4  ;;  %p1432_p11 = pnand %p1014_p0, %p46_p5  ;;  %s312_s19 = int_to_ptr.vmem [resolvable:$true] %s311_s19 }
  0x46   : > { %s301_s23 = scalar_lea.sflag [#allocation3], %s300_s16  ;;  %s1138_s24 = scalar_lea.hbm %s1430_s17, 128 }
  0x47   : > { %p1139_p7 = scmp.ne.s32.totalorder %s1430_s17, %s1138_s24  ;;  %p1140_p1 = pneg %p1432_p11 }
  0x48   : > { %s1143_s15 = scalar_lea.hbm %s1599_s0, 256  ;;  %p1144_p2 = scmp.lt.s32.totalorder %s1430_s17, %s1599_s0 }
  0x49   : > { %p1141_p9 = pnand %p1140_p1, %p1139_p7  ;;  %p1145_p4 = scmp.lt.s32.totalorder %s1143_s15, %s1138_s24 }
  0x4b   : > { %p1142_p13 = pneg %p1141_p9  ;;  %p1146_p6 = por %p1145_p4, %p1144_p2 }
  0x4d   : > { %p1147_p12 = pnand %p1146_p6, %p1142_p13 }
  0x4f   : > { %1150 = shalt.err (!%p1147_p12)
}
  0x50   : > { %s1151_s18 = scalar_lea.vmem %s312_s19, 128  ;;  %s1277_s16 = smov [#allocation2]  }
  0x51   : > { %p1152_p0 = scmp.ne.s32.totalorder %s312_s19, %s1151_s18  ;;  %s1156_s3 = sshll.u32 %s1277_s16, 4  ;;  %s1157_s3 = int_to_ptr.vmem [resolvable:$false] %s1156_s3 }
  0x52   : > { %s1158_s5 = scalar_lea.vmem %s1157_s3, 256  ;;  %p1159_p7 = scmp.lt.s32.totalorder %s312_s19, %s1157_s3 }
  0x53   : > { %p1154_p5 = pnand %p1152_p0, %p1140_p1  ;;  %p1160_p9 = scmp.lt.s32.totalorder %s1158_s5, %s1151_s18 }
  0x55   : > { %p1155_p3 = pneg %p1154_p5  ;;  %p1161_p10 = por %p1160_p9, %p1159_p7 }
  0x57   : > { %p1162_p8 = pnand %p1161_p10, %p1155_p3 }
  0x59   : > { %1165 = shalt.err (!%p1162_p8)
}
  0x5a   : > { %1003 = dma.hbm_to_vmem [thread:$0]  (!%p1432_p11), %s1430_s17, 128, %s312_s19, %s301_s23  }
  0x5b   : > { %p1625_p13 = scmp.ne.s32.totalorder %s1617_s13, 0 }
  0x5c   : > { %s1453_s1 = sand.u32 (!%p1625_p13), 1, %s1260_s28   ;;  %p1626_p10 = scmp.ne.s32.totalorder (!%p1625_p13), %s1615_s11, 0 }
  0x5d   : > { %320 = sbr.rel (%p1625_p13) target bundleno = 763 (0x2fb), region = 48  ;;  %s1456_s24 = sshll.u32 (!%p1625_p13), %s1453_s1, 3 }
  0x5e   : > { %s323_s3 = scalar_lea.sflag (!%p1625_p13), [#allocation3], %s1453_s1  ;;  %s326_s5 = scalar_lea.vmem (!%p1625_p13), [#allocation2], %s1456_s24 }
  0x62   : > { %1235 = dma.done.wait (%p1626_p10), %s323_s3, 128  }
  0x63   : > { %1237 = vsyncadd (%p1626_p10), %s323_s3, 4294967168  ;;  %p1627_p8 = scmp.eq.s32.totalorder %s1348_s9, 0 }
  0x65   : > { %1239 = dma.done.wait (%p1627_p8), [#allocation6], 4096   ;;  %p1628_p11 = pmov %p1627_p8 }
  0x66   : > { %p1629_p1 = pmov %p1627_p8 }
  0x67   : > { %1241 = vsyncadd (%p1628_p11), [#allocation6], 4294963200 }
  0x68   : > { %1243 = dma.done.wait (%p1629_p1), [#allocation9], 4096   ;;  %p1630_p2 = pmov %p1629_p1 }
  0x69   : > { %v1278_v0 = vmov 0.0   ;;  %vm1279_vm0 = vmmov 0   ;;  %v392_v1 = vld [vmem:[#allocation5 + $0x78] sm:$0xff]  ;;  %v391_v2 = vld [vmem:[#allocation5 + $0x70] sm:$0xff]  ;;  %v390_v3 = vld [vmem:[#allocation5 + $0x68] sm:$0xff]  ;;  %s864_s10 = sshll.u32 %s1348_s9, 7 }
  0x6a   : > { %1245 = vsyncadd (%p1630_p2), [#allocation9], 4294963200  ;;  %902 = vmatprep.subr.mxu0 %v1278_v0  ;;  %934 = vmatprep.mubr.msk.f32.mxu0 %vm1279_vm0, %v1278_v0  ;;  %v389_v4 = vld [vmem:[#allocation5 + $0x60] sm:$0xff]  ;;  %v486_v5 = vld [vmem:[#allocation7 + $0x78] sm:$0xff]  ;;  %s368_s14 = scalar_lea.vmem [#allocation10], %s1456_s24  ;;  %s375_s20 = scalar_lea.vmem [#allocation11], %s1456_s24 }
  0x6b   : > { %937 = vmatprep.subr.mxu1 %v1278_v0  ;;  %969 = vmatprep.mubr.msk.f32.mxu1 %vm1279_vm0, %v1278_v0  ;;  %v388_v6 = vld [vmem:[#allocation5 + $0x58] sm:$0xff]  ;;  %v485_v7 = vld [vmem:[#allocation7 + $0x70] sm:$0xff]  ;;  %v484_v8 = vld [vmem:[#allocation7 + $0x68] sm:$0xff]  ;;  %s701_s15 = sshll.u32 %s368_s14, 4  ;;  %s714_s18 = sshll.u32 %s375_s20, 4  ;;  %s1528_s15 = int_to_ptr.vmem [resolvable:$true] %s701_s15  ;;  %s1535_s18 = int_to_ptr.vmem [resolvable:$true] %s714_s18 }
  0x6c   : > { %903 = vmatpush3.msra.mxu0 %v392_v1  ;;  %938 = vmatpush3.msra.mxu1 %v486_v5  ;;  %v387_v9 = vld [vmem:[#allocation5 + $0x50] sm:$0xff]  ;;  %v483_v10 = vld [vmem:[#allocation7 + $0x60] sm:$0xff]  ;;  %v386_v11 = vld [vmem:[#allocation5 + $0x48] sm:$0xff]  ;;  %s1533_s13 = scalar_lea.hbm %s1607_s8, %s864_s10  ;;  %s683_s17 = scalar_lea.sflag [#allocation4], %s1453_s1 }
  0x6d   : > { %904 = vmatprep.subr.mxu0 %v1278_v0  ;;  %939 = vmatprep.subr.mxu1 %v1278_v0  ;;  %v482_v12 = vld [vmem:[#allocation7 + $0x58] sm:$0xff]  ;;  %v385_v13 = vld [vmem:[#allocation5 + $0x40] sm:$0xff]  ;;  %v481_v14 = vld [vmem:[#allocation7 + $0x50] sm:$0xff]  ;;  %s1166_s19 = scalar_lea.vmem %s1528_s15, 128  ;;  %p1631_p6 = scmp.ne.s32.totalorder %s1623_s26, 0 }
  0x6e   : > { %905 = vmatpush3.msra.mxu0 %v391_v2  ;;  %940 = vmatpush3.msra.mxu1 %v485_v7  ;;  %v384_v15 = vld [vmem:[#allocation5 + $0x38] sm:$0xff]  ;;  %v480_v16 = vld [vmem:[#allocation7 + $0x48] sm:$0xff]  ;;  %v383_v17 = vld [vmem:[#allocation5 + $0x30] sm:$0xff]  ;;  %p1167_p4 = scmp.ne.s32.totalorder %s1528_s15, %s1166_s19  ;;  %s1280_s21 = smov [#allocation10]  }
  0x6f   : > { %906 = vmatprep.subr.mxu0 %v1278_v0  ;;  %941 = vmatprep.subr.mxu1 %v1278_v0  ;;  %v479_v18 = vld [vmem:[#allocation7 + $0x40] sm:$0xff]  ;;  %v382_v19 = vld [vmem:[#allocation5 + $0x28] sm:$0xff]  ;;  %v478_v20 = vld [vmem:[#allocation7 + $0x38] sm:$0xff]  ;;  %s1170_s23 = sshll.u32 %s1280_s21, 4  ;;  %s1171_s23 = int_to_ptr.vmem [resolvable:$false] %s1170_s23 }
  0x70   : > { %907 = vmatpush3.msra.mxu0 %v390_v3  ;;  %942 = vmatpush3.msra.mxu1 %v484_v8  ;;  %v381_v21 = vld [vmem:[#allocation5 + $0x20] sm:$0xff]  ;;  %v477_v22 = vld [vmem:[#allocation7 + $0x30] sm:$0xff]  ;;  %v380_v23 = vld [vmem:[#allocation5 + $0x18] sm:$0xff]  ;;  %p1168_p12 = pnand %p1167_p4, %p1631_p6  ;;  %s1172_s16 = scalar_lea.vmem %s1171_s23, 256 }
  0x71   : > { %908 = vmatprep.subr.mxu0 %v1278_v0  ;;  %943 = vmatprep.subr.mxu1 %v1278_v0  ;;  %v476_v24 = vld [vmem:[#allocation7 + $0x28] sm:$0xff]  ;;  %v379_v25 = vld [vmem:[#allocation5 + $0x10] sm:$0xff]  ;;  %v475_v26 = vld [vmem:[#allocation7 + $0x20] sm:$0xff]  ;;  %p1173_p5 = scmp.lt.s32.totalorder %s1528_s15, %s1171_s23  ;;  %p1174_p3 = scmp.lt.s32.totalorder %s1172_s16, %s1166_s19 }
  0x72   : > { %909 = vmatpush3.msra.mxu0 %v389_v4  ;;  %944 = vmatpush3.msra.mxu1 %v483_v10  ;;  %v378_v27 = vld [vmem:[#allocation5 + $0x8] sm:$0xff]  ;;  %v474_v28 = vld [vmem:[#allocation7 + $0x18] sm:$0xff]  ;;  %v377_v29 = vld [vmem:[#allocation5] sm:$0xff]  ;;  %p1169_p0 = pneg %p1168_p12 }
  0x73   : > { %910 = vmatprep.subr.mxu0 %v1278_v0  ;;  %945 = vmatprep.subr.mxu1 %v1278_v0  ;;  %v376_v30 = vld [vmem:[%s326_s5] sm:$0xff]  ;;  %v472_v32 = vld [vmem:[#allocation7 + $0x8] sm:$0xff]  ;;  %v471_v33 = vld [vmem:[#allocation7] sm:$0xff]  ;;  %s1526_s5 = scalar_lea.hbm %s1606_s7, %s864_s10  ;;  %p1175_p7 = por %p1174_p3, %p1173_p5 }
  0x74   : > { %911 = vmatpush3.msra.mxu0 %v388_v6  ;;  %946 = vmatpush3.msra.mxu1 %v482_v12  ;;  %v473_v31 = vld [vmem:[#allocation7 + $0x10] sm:$0xff]  ;;  %v596_v34 = vld [vmem:[#allocation8 + $0xf8] sm:$0xff]  ;;  %v594_v36 = vld [vmem:[#allocation8 + $0xe8] sm:$0xff]  ;;  %v599_v12 = vlaneseq }
  0x75   : > { %912 = vmatprep.subr.mxu0 %v1278_v0  ;;  %947 = vmatprep.subr.mxu1 %v1278_v0  ;;  %v595_v35 = vld [vmem:[#allocation8 + $0xf0] sm:$0xff]  ;;  %v593_v37 = vld [vmem:[#allocation8 + $0xe0] sm:$0xff]  ;;  %v592_v38 = vld [vmem:[#allocation8 + $0xd8] sm:$0xff]  ;;  %p1176_p9 = pnand %p1175_p7, %p1169_p0 }
  0x76   : > { %913 = vmatpush3.msra.mxu0 %v387_v9  ;;  %948 = vmatpush3.msra.mxu1 %v481_v14  ;;  %v591_v39 = vld [vmem:[#allocation8 + $0xd0] sm:$0xff]  ;;  %v590_v40 = vld [vmem:[#allocation8 + $0xc8] sm:$0xff]  ;;  %v589_v41 = vld [vmem:[#allocation8 + $0xc0] sm:$0xff] }
  0x77   : > { %914 = vmatprep.subr.mxu0 %v1278_v0  ;;  %949 = vmatprep.subr.mxu1 %v1278_v0  ;;  %v588_v42 = vld [vmem:[#allocation8 + $0xb8] sm:$0xff]  ;;  %v587_v43 = vld [vmem:[#allocation8 + $0xb0] sm:$0xff]  ;;  %v586_v44 = vld [vmem:[#allocation8 + $0xa8] sm:$0xff] }
  0x78   : > { %915 = vmatpush3.msra.mxu0 %v386_v11  ;;  %950 = vmatpush3.msra.mxu1 %v480_v16  ;;  %v585_v45 = vld [vmem:[#allocation8 + $0xa0] sm:$0xff]  ;;  %v584_v46 = vld [vmem:[#allocation8 + $0x98] sm:$0xff]  ;;  %v583_v47 = vld [vmem:[#allocation8 + $0x90] sm:$0xff] }
  0x79   : > { %916 = vmatprep.subr.mxu0 %v1278_v0  ;;  %951 = vmatprep.subr.mxu1 %v1278_v0  ;;  %v582_v48 = vld [vmem:[#allocation8 + $0x88] sm:$0xff]  ;;  %v581_v49 = vld [vmem:[#allocation8 + $0x80] sm:$0xff]  ;;  %v580_v50 = vld [vmem:[#allocation8 + $0x78] sm:$0xff] }
  0x7a   : > { %917 = vmatpush3.msra.mxu0 %v385_v13  ;;  %952 = vmatpush3.msra.mxu1 %v479_v18  ;;  %v579_v51 = vld [vmem:[#allocation8 + $0x70] sm:$0xff]  ;;  %v578_v52 = vld [vmem:[#allocation8 + $0x68] sm:$0xff]  ;;  %v577_v53 = vld [vmem:[#allocation8 + $0x60] sm:$0xff]  ;;  %v600_v13 = vshrl.u32 %v599_v12, 7 }
  0x7b   : > { %918 = vmatprep.subr.mxu0 %v1278_v0  ;;  %953 = vmatprep.subr.mxu1 %v1278_v0  ;;  %v576_v54 = vld [vmem:[#allocation8 + $0x58] sm:$0xff]  ;;  %v575_v55 = vld [vmem:[#allocation8 + $0x50] sm:$0xff]  ;;  %v574_v56 = vld [vmem:[#allocation8 + $0x48] sm:$0xff] }
  0x7c   : > { %919 = vmatpush3.msra.mxu0 %v384_v15  ;;  %954 = vmatpush3.msra.mxu1 %v478_v20  ;;  %v573_v57 = vld [vmem:[#allocation8 + $0x40] sm:$0xff]  ;;  %v572_v58 = vld [vmem:[#allocation8 + $0x38] sm:$0xff]  ;;  %v571_v59 = vld [vmem:[#allocation8 + $0x30] sm:$0xff]  ;;  %v601_v14 = vsub.s32 0, %v600_v13  ;;  %v605_v16 = vsub.s32 1, %v600_v13 }
  0x7d   : > { %920 = vmatprep.subr.mxu0 %v1278_v0  ;;  %955 = vmatprep.subr.mxu1 %v1278_v0  ;;  %v570_v60 = vld [vmem:[#allocation8 + $0x28] sm:$0xff]  ;;  %v860_v61 = vld [vmem:[%s1601_s2] ss:$0 sm:$0xff]  ;;  %v569_v2 = vld [vmem:[#allocation8 + $0x20] sm:$0xff] }
  0x7e   : > { %921 = vmatpush3.msra.mxu0 %v383_v17  ;;  %956 = vmatpush3.msra.mxu1 %v477_v22  ;;  %v568_v3 = vld [vmem:[#allocation8 + $0x18] sm:$0xff]  ;;  %v567_v4 = vld [vmem:[#allocation8 + $0x10] sm:$0xff]  ;;  %v566_v5 = vld [vmem:[#allocation8 + $0x8] sm:$0xff] }
  0x7f   : > { %922 = vmatprep.subr.mxu0 %v1278_v0  ;;  %957 = vmatprep.subr.mxu1 %v1278_v0  ;;  %v565_v6 = vld [vmem:[#allocation8] sm:$0xff]  ;;  %v861_v7 = vld [vmem:[%s1603_s4] ss:$0 sm:$0xff] }
  0x80   : > { %923 = vmatpush3.msra.mxu0 %v382_v19  ;;  %958 = vmatpush3.msra.mxu1 %v476_v24  ;;  %v597_v15 = vld [vmem:[%s1605_s6] sm:$0x3] }
  0x81   : > { %924 = vmatprep.subr.mxu0 %v1278_v0  ;;  %959 = vmatprep.subr.mxu1 %v1278_v0  ;;  %v602_v17 = vrot.slane %v597_v15, %v601_v14  ;;  %v606_v18 = vrot.slane %v597_v15, %v605_v16 }
  0x82   : > { %925 = vmatpush3.msra.mxu0 %v381_v21  ;;  %960 = vmatpush3.msra.mxu1 %v475_v26 }
  0x83   : > { %926 = vmatprep.subr.mxu0 %v1278_v0  ;;  %961 = vmatprep.subr.mxu1 %v1278_v0 }
  0x84   : > { %927 = vmatpush3.msra.mxu0 %v380_v23  ;;  %962 = vmatpush3.msra.mxu1 %v474_v28 }
  0x85   : > { %928 = vmatprep.subr.mxu0 %v1278_v0  ;;  %963 = vmatprep.subr.mxu1 %v1278_v0 }
  0x86   : > { %929 = vmatpush3.msra.mxu0 %v379_v25  ;;  %964 = vmatpush3.msra.mxu1 %v473_v31 }
  0x87   : > { %930 = vmatprep.subr.mxu0 %v1278_v0  ;;  %965 = vmatprep.subr.mxu1 %v1278_v0 }
  0x88   : > { %931 = vmatpush3.msra.mxu0 %v378_v27  ;;  %966 = vmatpush3.msra.mxu1 %v472_v32 }
  0x89   : > { %932 = vmatprep.subr.mxu0 %v1278_v0  ;;  %967 = vmatprep.subr.mxu1 %v1278_v0 }
  0x8a   : > { %933 = vmatpush3.msra.mxu0 %v377_v29  ;;  %968 = vmatpush3.msra.mxu1 %v471_v33 }
  0x8b   : > { %935 = vmatmul.mubr.f32.vlgmr.msra.gmra.mxu0 %v376_v30  ;;  %609 = vmatprep.subr.mxu0 %v596_v34 }
  0x8c   : > { %673 = vmatprep.mubr.f32.mxu0 %v1278_v0  ;;  %610 = vmatpush1.msra.mxu0 %v595_v35 }
  0x8d   : > { %611 = vmatprep.subr.mxu0 %v594_v36 }
  0x8e   : > { %612 = vmatpush1.msra.mxu0 %v593_v37 }
  0x8f   : > { %613 = vmatprep.subr.mxu0 %v592_v38 }
  0x90   : > { %614 = vmatpush1.msra.mxu0 %v591_v39 }
  0x91   : > { %615 = vmatprep.subr.mxu0 %v590_v40 }
  0x92   : > { %616 = vmatpush1.msra.mxu0 %v589_v41 }
  0x93   : > { %617 = vmatprep.subr.mxu0 %v588_v42 }
  0x94   : > { %618 = vmatpush1.msra.mxu0 %v587_v43 }
  0x95   : > { %619 = vmatprep.subr.mxu0 %v586_v44 }
  0x96   : > { %620 = vmatpush1.msra.mxu0 %v585_v45 }
  0x97   : > { %621 = vmatprep.subr.mxu0 %v584_v46 }
  0x98   : > { %622 = vmatpush1.msra.mxu0 %v583_v47 }
  0x99   : > { %623 = vmatprep.subr.mxu0 %v582_v48 }
  0x9a   : > { %624 = vmatpush1.msra.mxu0 %v581_v49 }
  0x9b   : > { %625 = vmatprep.subr.mxu0 %v580_v50 }
  0x9c   : > { %626 = vmatpush1.msra.mxu0 %v579_v51 }
  0x9d   : > { %627 = vmatprep.subr.mxu0 %v578_v52 }
  0x9e   : > { %628 = vmatpush1.msra.mxu0 %v577_v53 }
  0x9f   : > { %629 = vmatprep.subr.mxu0 %v576_v54 }
  0xa0   : > { %630 = vmatpush1.msra.mxu0 %v575_v55 }
  0xa1   : > { %631 = vmatprep.subr.mxu0 %v574_v56 }
  0xa2   : > { %632 = vmatpush1.msra.mxu0 %v573_v57 }
  0xa3   : > { %633 = vmatprep.subr.mxu0 %v572_v58 }
  0xa4   : > { %634 = vmatpush1.msra.mxu0 %v571_v59 }
  0xa5   : > { %635 = vmatprep.subr.mxu0 %v570_v60 }
  0xa6   : > { %636 = vmatpush1.msra.mxu0 %v569_v2 }
  0xa7   : > { %637 = vmatprep.subr.mxu0 %v568_v3 }
  0xa8   : > { %638 = vmatpush1.msra.mxu0 %v567_v4 }
  0xa9   : > { %639 = vmatprep.subr.mxu0 %v566_v5 }
  0xaa   : > { %640 = vmatpush1.msra.mxu0 %v565_v6 }
 0x14b   : > { %v466_v62 = vpop.f32.mrf.mxu0 }
 0x14c   : > { %v467_v63 = vadd.f32 %v860_v61, %v466_v62 }
 0x14d   : > { %v936_v0 = vpop.f32.mrf.mxu0 }
 0x14e   : > { %v470_v1 = vmax.f32 %v467_v63, 0.0 }
 0x150   : > { %970 = vmatmul.mubr.f32.vlgmr.msra.gmra.mxu1 %v470_v1 }
 0x210   : > { %v560_v8 = vpop.f32.mrf.mxu1 }
 0x211   : > { %v561_v9 = vadd.f32 %v861_v7, %v560_v8 }
 0x212   : > { %v971_v10 = vpop.f32.mrf.mxu1 }
 0x213   : > { %v564_v11 = vmax.f32 %v561_v9, 0.0 }
 0x215   : > { %674 = vmatmul.mubr.f32.vlgmr.msra.gmra.mxu0 %v564_v11 }
 0x2d5   : > { %v675_v19 = vpop.f32.mrf.mxu0 }
 0x2d6   : > { %v676_v20 = vadd.f32 %v675_v19, %v602_v17 }
 0x2d7   : > { %v677_v21 = vpop.f32.mrf.mxu0 }
 0x2d8   : > { %680 = vst [vmem:[%s368_s14] sm:$0xff] %v676_v20  ;;  %v678_v22 = vadd.f32 %v677_v21, %v606_v18 }
 0x2d9   : > { %1179 = shalt.err (!%p1176_p9)
}
 0x2da   : > { %s1180_s10 = scalar_lea.hbm %s1526_s5, 128  ;;  %s1184_s9 = scalar_lea.hbm %s1606_s7, 256 }
 0x2db   : > { %p1181_p13 = scmp.ne.s32.totalorder %s1526_s5, %s1180_s10  ;;  %p1185_p11 = scmp.lt.s32.totalorder %s1526_s5, %s1606_s7 }
 0x2dc   : > { %p1186_p1 = scmp.lt.s32.totalorder %s1184_s9, %s1180_s10 }
 0x2dd   : > { %p1182_p10 = pnand %p1181_p13, %p1631_p6 }
 0x2de   : > { %p1187_p2 = por %p1186_p1, %p1185_p11 }
 0x2df   : > { %p1183_p8 = pneg %p1182_p10 }
 0x2e1   : > { %p1188_p4 = pnand %p1187_p2, %p1183_p8 }
 0x2e3   : > { %1191 = shalt.err (!%p1188_p4)
}
 0x2e4   : > { %986 = dma.vmem_to_hbm [thread:$0]  (%p1631_p6), %s1528_s15, 128, %s1526_s5, %s683_s17   ;;  %681 = vst [vmem:[%s375_s20] sm:$0xff] %v678_v22 }
 0x2e5   : > { %s688_s19 = scalar_lea.sflag [#allocation12], %s1453_s1  ;;  %s1192_s23 = scalar_lea.vmem %s1535_s18, 128 }
 0x2e6   : > { %p1193_p12 = scmp.ne.s32.totalorder %s1535_s18, %s1192_s23  ;;  %s1281_s16 = smov [#allocation11]  }
 0x2e7   : > { %s1196_s10 = sshll.u32 %s1281_s16, 4  ;;  %s1197_s10 = int_to_ptr.vmem [resolvable:$false] %s1196_s10 }
 0x2e8   : > { %p1194_p0 = pnand %p1193_p12, %p1631_p6  ;;  %s1198_s14 = scalar_lea.vmem %s1197_s10, 256 }
 0x2e9   : > { %p1199_p3 = scmp.lt.s32.totalorder %s1535_s18, %s1197_s10  ;;  %p1200_p7 = scmp.lt.s32.totalorder %s1198_s14, %s1192_s23 }
 0x2ea   : > { %p1195_p5 = pneg %p1194_p0 }
 0x2eb   : > { %p1201_p9 = por %p1200_p7, %p1199_p3 }
 0x2ed   : > { %p1202_p13 = pnand %p1201_p9, %p1195_p5 }
 0x2ef   : > { %1205 = shalt.err (!%p1202_p13)
}
 0x2f0   : > { %s1206_s24 = scalar_lea.hbm %s1533_s13, 128  ;;  %s1210_s20 = scalar_lea.hbm %s1607_s8, 256 }
 0x2f1   : > { %p1207_p10 = scmp.ne.s32.totalorder %s1533_s13, %s1206_s24  ;;  %p1211_p1 = scmp.lt.s32.totalorder %s1533_s13, %s1607_s8 }
 0x2f2   : > { %p1212_p2 = scmp.lt.s32.totalorder %s1210_s20, %s1206_s24 }
 0x2f3   : > { %p1208_p8 = pnand %p1207_p10, %p1631_p6 }
 0x2f4   : > { %p1213_p4 = por %p1212_p2, %p1211_p1 }
 0x2f5   : > { %p1209_p11 = pneg %p1208_p8 }
 0x2f7   : > { %p1214_p12 = pnand %p1213_p4, %p1209_p11 }
 0x2f9   : > { %1217 = shalt.err (!%p1214_p12)
}
 0x2fa   : > { %987 = dma.vmem_to_hbm [thread:$0]  (%p1631_p6), %s1535_s18, 128, %s1533_s13, %s688_s19  }
 0x2fb PF: > { %s726_s3 = sand.u32 1, %s1256_s27   ;;  %p1632_p0 = scmp.ne.s32.totalorder %s1616_s12, 0 }
 0x2fc   : > { %p1633_p5 = scmp.ge.s32.totalorder %s1268_s30, 2  ;;  %s727_s9 = scalar_lea.sflag [#allocation4], %s726_s3 }
 0x2fe   : > { %p1005_p3 = pnand %p1633_p5, %p1632_p0 }
 0x300   : > { %p1006_p7 = pneg %p1005_p3 }
 0x302   : > { %1247 = dma.done.wait (%p1006_p7), %s727_s9, 128  }
 0x303   : > { %1249 = vsyncadd (%p1006_p7), %s727_s9, 4294967168  ;;  %s736_s11 = scalar_lea.sflag [#allocation12], %s726_s3 }
 0x304   : > { %1251 = dma.done.wait (%p1006_p7), %s736_s11, 128  }
 0x305   : > { %1253 = vsyncadd (%p1006_p7), %s736_s11, 4294967168  ;;  %p27_p6 = scmp.ge.s32.totalorder %s1407_s22, 4   ;;  %s1634_s27 = smov %s1260_s28 }
 0x306   : > { %s1635_s28 = smov %s1264_s29  ;;  %s1636_s29 = smov %s1417_s25 }
 0x307   : > { %s1637_s30 = smov %s1407_s22  ;;  %29 = sbr.rel (!%p27_p6) target bundleno = 13 (0xd), region = 122 }
 0x30c   :  { %741 = vsyncpa [#allocation3], 1 }
 0x30d   :  { %743 = vsyncpa [#allocation3 + $0x1], 1 }
 0x30e   :  { %744 = vsyncpa [#allocation6], 1 }
 0x30f   :  { %745 = vsyncpa [#allocation9], 1 }
 0x310   :  { %746 = vsyncpa [#allocation4], 1 }
 0x311   :  { %748 = vsyncpa [#allocation4 + $0x1], 1 }
 0x312   :  { %749 = vsyncpa [#allocation12], 1 }
 0x313   :  { %751 = vsyncpa [#allocation12 + $0x1], 1 }

// kernel: tpu_custom_call.1
= control target key start
LH: loop header
LB: loop body
LE: loop exit
PB: predicated region body
PF: predicated region fallthrough
CT: control target
= control target key end

     0   :  { %s1599_s0 = inlined_call_operand.hbm [shape: f32[16,128], index: 0, kind: input, shape index: {}]   ;;  %s1600_s1 = inlined_call_operand.hbm [shape: f32[128,128], index: 1, kind: input, shape index: {}]   ;;  %s1601_s2 = inlined_call_operand.vmem [shape: f32[1,128], index: 2, kind: input, shape index: {}]   ;;  %s1602_s3 = inlined_call_operand.hbm [shape: f32[128,128], index: 3, kind: input, shape index: {}]   ;;  %s1603_s4 = inlined_call_operand.vmem [shape: f32[1,128], index: 4, kind: input, shape index: {}]   ;;  %s1604_s5 = inlined_call_operand.hbm [shape: f32[128,256], index: 5, kind: input, shape index: {}]   ;;  %s1605_s6 = inlined_call_operand.vmem [shape: f32[1,256], index: 6, kind: input, shape index: {}]   ;;  %s1606_s7 = inlined_call_operand.hbm [shape: f32[16,128], index: 7, kind: output, shape index: {0}]   ;;  %s1607_s8 = inlined_call_operand.hbm [shape: f32[16,128], index: 8, kind: output, shape index: {1}]  }
   0x1   :  { %1612 = sst [smem:[#allocation18_spill]] %s1600_s1 }
   0x2   :  { %1613 = sst [smem:[#allocation19_spill]] %s1602_s3 }
   0x3   :  { %1614 = sst [smem:[#allocation20_spill]] %s1604_s5 }
   0x4   :  { %14 = vsyncpa [#allocation3], 0 }
   0x5   :  { %16 = vsyncpa [#allocation3 + $0x1], 0 }
   0x6   :  { %17 = vsyncpa [#allocation6], 0 }
   0x7   :  { %18 = vsyncpa [#allocation9], 0 }
   0x8   :  { %19 = vsyncpa [#allocation4], 0 }
   0x9   :  { %21 = vsyncpa [#allocation4 + $0x1], 0 }
   0xa   :  { %22 = vsyncpa [#allocation12], 0 }
   0xb   :  { %24 = vsyncpa [#allocation12 + $0x1], 0  ;;  %s1327_s27 = smov 0   ;;  %s1329_s28 = smov 0  }
   0xc   :  { %s1331_s29 = smov 0   ;;  %s1333_s30 = smov 0  }
   0xd LB: > { %s1348_s9 = sadd.s32 4294967295, %s1268_s30   ;;  %s845_s10 = sadd.s32 4294967294, %s1268_s30   ;;  %s1268_s30 = sphi %s1333_s30, %s1637_s30   ;;  %s1264_s29 = sphi %s1331_s29, %s1636_s29   ;;  %s1260_s28 = sphi %s1329_s28, %s1635_s28   ;;  %s1256_s27 = sphi %s1327_s27, %s1634_s27  }
   0xe   : > { %p50_p0 = scmp.ne.s32.totalorder %s1260_s28, %s1256_s27  ;;  %p1608_p1 = scmp.eq.s32.totalorder %s1348_s9, 0 }
   0xf   : > { %p206_p3 = scmp.eq.s32.totalorder %s845_s10, 1  ;;  %p846_p5 = scmp.ge.s32.totalorder %s1268_s30, 1 }
  0x10   : > { %p1357_p4 = por %p1608_p1, %p50_p0  ;;  %p239_p7 = scmp.lt.s32.totalorder %s1268_s30, 3 }
  0x11   : > { %p1362_p6 = por %p206_p3, %p50_p0  ;;  %s1270_s14 = smov [#allocation5]  }
  0x12   : > { %s1615_s11 = scalar_select %p1357_p4, 1, 0 }
  0x13   : > { %s1616_s12 = scalar_select %p1362_p6, 1, 0 }
  0x14   : > { %p1367_p8 = pnand %p846_p5, %p239_p7  ;;  %s251_s15 = sshll.u32 %s1270_s14, 4  ;;  %s252_s15 = int_to_ptr.vmem [resolvable:$true] %s251_s15 }
  0x15   : > { %s1271_s17 = smov [#allocation7]   ;;  %s1272_s19 = smov [#allocation8]  }
  0x16   : > { %s1617_s13 = scalar_select %p1367_p8, 1, 0 }
  0x17   : > { %p990_p9 = pneg %p1367_p8  ;;  %s267_s18 = sshll.u32 %s1271_s17, 4  ;;  %s268_s18 = int_to_ptr.vmem [resolvable:$true] %s267_s18 }
  0x18   : > { %s283_s20 = sshll.u32 %s1272_s19, 4  ;;  %s1071_s21 = scalar_lea.vmem %s252_s15, 2048  ;;  %s284_s20 = int_to_ptr.vmem [resolvable:$true] %s283_s20 }
  0x19   : > { %p1376_p11 = pnand %p990_p9, %p1608_p1  ;;  %p1072_p13 = scmp.ne.s32.totalorder %s252_s15, %s1071_s21 }
  0x1a   : > { %p1079_p5 = scmp.lt.s32.totalorder %s252_s15, %s252_s15  ;;  %p1080_p7 = scmp.lt.s32.totalorder %s1071_s21, %s1071_s21 }
  0x1b   : > { %p1062_p12 = pneg %p1376_p11 }
  0x1c   : > { %p1081_p9 = por %p1080_p7, %p1079_p5 }
  0x1d   : > { %p1074_p0 = pnand %p1072_p13, %p1062_p12 }
  0x1f   : > { %p1075_p3 = pneg %p1074_p0 }
  0x21   : > { %p1082_p10 = pnand %p1081_p9, %p1075_p3 }
  0x23   : > { %1085 = shalt.err (!%p1082_p10)
}
  0x24   : > { %s1273_s22 = smov 128   ;;  %s1274_s23 = smov 8  }
  0x25   : > { %s1619_s1 = sld [smem:[#allocation18_spill]]  ;;  %s1097_s26 = scalar_lea.vmem %s268_s18, 2048 }
  0x26   : > { %p1098_p1 = scmp.ne.s32.totalorder %s268_s18, %s1097_s26  ;;  %p1105_p2 = scmp.lt.s32.totalorder %s268_s18, %s268_s18 }
  0x27   : > { %p1106_p6 = scmp.lt.s32.totalorder %s1097_s26, %s1097_s26 }
  0x28   : > { %p1100_p13 = pnand %p1098_p1, %p1062_p12 }
  0x29   : > { %p1107_p5 = por %p1106_p6, %p1105_p2 }
  0x2a   : > { %p1101_p0 = pneg %p1100_p13 }
  0x2b   : > { %993 = dma.hbm_to_vmem [thread:$0]  (!%p1376_p11), %s1619_s1, 2048, %s252_s15, [#allocation6], %s1273_s22, %s1273_s22, %s1274_s23  }
  0x2c   : > { %p1108_p3 = pnand %p1107_p5, %p1101_p0 }
  0x2e   : > { %1111 = shalt.err (!%p1108_p3)
}
  0x2f   : > { %s1620_s3 = sld [smem:[#allocation19_spill]]  ;;  %s1123_s15 = scalar_lea.vmem %s284_s20, 4096 }
  0x30   : > { %p1124_p10 = scmp.ne.s32.totalorder %s284_s20, %s1123_s15  ;;  %p1131_p9 = scmp.lt.s32.totalorder %s284_s20, %s284_s20 }
  0x31   : > { %p1132_p13 = scmp.lt.s32.totalorder %s1123_s15, %s1123_s15 }
  0x32   : > { %p1126_p7 = pnand %p1124_p10, %p1062_p12 }
  0x33   : > { %p1133_p4 = por %p1132_p13, %p1131_p9 }
  0x34   : > { %p1127_p1 = pneg %p1126_p7 }
  0x35   : > { %996 = dma.hbm_to_vmem [thread:$0]  (!%p1376_p11), %s1620_s3, 2048, %s268_s18, [#allocation6], %s1273_s22, %s1273_s22, %s1274_s23  }
  0x36   : > { %p1134_p2 = pnand %p1133_p4, %p1127_p1 }
  0x38   : > { %1137 = shalt.err (!%p1134_p2)
}
  0x39   : > { %s1275_s17 = smov 256   ;;  %s1276_s18 = smov 16  }
  0x3a   : > { %s1621_s5 = sld [smem:[#allocation20_spill]]  ;;  %s1407_s22 = sadd.s32 1, %s1268_s30  }
  0x3b   : > { %s34_s23 = ssub.s32 %s1268_s30, %s1407_s22  ;;  %s37_s24 = sadd.s32 1, %s1264_s29 }
  0x3c   : > { %p35_p4 = scmp.eq.s32.totalorder %s34_s23, 0  ;;  %p44_p6 = scmp.ne.s32.totalorder %s1264_s29, %s1260_s28 }
  0x3d   : > { %p45_p12 = scmp.eq.s32.totalorder %s1268_s30, 0  ;;  %p1014_p0 = scmp.lt.s32.totalorder %s1268_s30, 2 }
  0x3e   : > { %s1417_s25 = scalar_select %p35_p4, %s1264_s29, %s37_s24  }
  0x3f   : > { %p46_p5 = por %p45_p12, %p44_p6  ;;  %p1622_p3 = scmp.eq.s32.totalorder %s1348_s9, 1 }
  0x40   : > { %999 = dma.hbm_to_vmem [thread:$0]  (!%p1376_p11), %s1621_s5, 4096, %s284_s20, [#allocation9], %s1275_s17, %s1275_s17, %s1276_s18  }
  0x41   : > { %p1421_p10 = por %p1622_p3, %p44_p6  ;;  %s300_s16 = sand.u32 1, %s1264_s29  }
  0x42   : > { %s852_s10 = sshll.u32 %s1268_s30, 7  ;;  %s851_s20 = sshll.u32 %s300_s16, 3 }
  0x43   : > { %s1623_s26 = scalar_select %p1421_p10, 1, 0 }
  0x44   : > { %s1430_s17 = scalar_lea.hbm %s1599_s0, %s852_s10  ;;  %s304_s18 = scalar_lea.vmem [#allocation2], %s851_s20 }
  0x45   : > { %s311_s19 = sshll.u32 %s304_s18, 4  ;;  %p1432_p11 = pnand %p1014_p0, %p46_p5  ;;  %s312_s19 = int_to_ptr.vmem [resolvable:$true] %s311_s19 }
  0x46   : > { %s301_s23 = scalar_lea.sflag [#allocation3], %s300_s16  ;;  %s1138_s24 = scalar_lea.hbm %s1430_s17, 128 }
  0x47   : > { %p1139_p7 = scmp.ne.s32.totalorder %s1430_s17, %s1138_s24  ;;  %p1140_p1 = pneg %p1432_p11 }
  0x48   : > { %s1143_s15 = scalar_lea.hbm %s1599_s0, 256  ;;  %p1144_p2 = scmp.lt.s32.totalorder %s1430_s17, %s1599_s0 }
  0x49   : > { %p1141_p9 = pnand %p1140_p1, %p1139_p7  ;;  %p1145_p4 = scmp.lt.s32.totalorder %s1143_s15, %s1138_s24 }
  0x4b   : > { %p1142_p13 = pneg %p1141_p9  ;;  %p1146_p6 = por %p1145_p4, %p1144_p2 }
  0x4d   : > { %p1147_p12 = pnand %p1146_p6, %p1142_p13 }
  0x4f   : > { %1150 = shalt.err (!%p1147_p12)
}
  0x50   : > { %s1151_s18 = scalar_lea.vmem %s312_s19, 128  ;;  %s1277_s16 = smov [#allocation2]  }
  0x51   : > { %p1152_p0 = scmp.ne.s32.totalorder %s312_s19, %s1151_s18  ;;  %s1156_s3 = sshll.u32 %s1277_s16, 4  ;;  %s1157_s3 = int_to_ptr.vmem [resolvable:$false] %s1156_s3 }
  0x52   : > { %s1158_s5 = scalar_lea.vmem %s1157_s3, 256  ;;  %p1159_p7 = scmp.lt.s32.totalorder %s312_s19, %s1157_s3 }
  0x53   : > { %p1154_p5 = pnand %p1152_p0, %p1140_p1  ;;  %p1160_p9 = scmp.lt.s32.totalorder %s1158_s5, %s1151_s18 }
  0x55   : > { %p1155_p3 = pneg %p1154_p5  ;;  %p1161_p10 = por %p1160_p9, %p1159_p7 }
  0x57   : > { %p1162_p8 = pnand %p1161_p10, %p1155_p3 }
  0x59   : > { %1165 = shalt.err (!%p1162_p8)
}
  0x5a   : > { %1003 = dma.hbm_to_vmem [thread:$0]  (!%p1432_p11), %s1430_s17, 128, %s312_s19, %s301_s23  }
  0x5b   : > { %p1625_p13 = scmp.ne.s32.totalorder %s1617_s13, 0 }
  0x5c   : > { %s1453_s1 = sand.u32 (!%p1625_p13), 1, %s1260_s28   ;;  %p1626_p10 = scmp.ne.s32.totalorder (!%p1625_p13), %s1615_s11, 0 }
  0x5d   : > { %320 = sbr.rel (%p1625_p13) target bundleno = 763 (0x2fb), region = 48  ;;  %s1456_s24 = sshll.u32 (!%p1625_p13), %s1453_s1, 3 }
  0x5e   : > { %s323_s3 = scalar_lea.sflag (!%p1625_p13), [#allocation3], %s1453_s1  ;;  %s326_s5 = scalar_lea.vmem (!%p1625_p13), [#allocation2], %s1456_s24 }
  0x62   : > { %1235 = dma.done.wait (%p1626_p10), %s323_s3, 128  }
  0x63   : > { %1237 = vsyncadd (%p1626_p10), %s323_s3, 4294967168  ;;  %p1627_p8 = scmp.eq.s32.totalorder %s1348_s9, 0 }
  0x65   : > { %1239 = dma.done.wait (%p1627_p8), [#allocation6], 4096   ;;  %p1628_p11 = pmov %p1627_p8 }
  0x66   : > { %p1629_p1 = pmov %p1627_p8 }
  0x67   : > { %1241 = vsyncadd (%p1628_p11), [#allocation6], 4294963200 }
  0x68   : > { %1243 = dma.done.wait (%p1629_p1), [#allocation9], 4096   ;;  %p1630_p2 = pmov %p1629_p1 }
  0x69   : > { %v1278_v0 = vmov 0.0   ;;  %vm1279_vm0 = vmmov 0   ;;  %v392_v1 = vld [vmem:[#allocation5 + $0x78] sm:$0xff]  ;;  %v391_v2 = vld [vmem:[#allocation5 + $0x70] sm:$0xff]  ;;  %v390_v3 = vld [vmem:[#allocation5 + $0x68] sm:$0xff]  ;;  %s864_s10 = sshll.u32 %s1348_s9, 7 }
  0x6a   : > { %1245 = vsyncadd (%p1630_p2), [#allocation9], 4294963200  ;;  %902 = vmatprep.subr.mxu0 %v1278_v0  ;;  %934 = vmatprep.mubr.msk.f32.mxu0 %vm1279_vm0, %v1278_v0  ;;  %v389_v4 = vld [vmem:[#allocation5 + $0x60] sm:$0xff]  ;;  %v486_v5 = vld [vmem:[#allocation7 + $0x78] sm:$0xff]  ;;  %s368_s14 = scalar_lea.vmem [#allocation10], %s1456_s24  ;;  %s375_s20 = scalar_lea.vmem [#allocation11], %s1456_s24 }
  0x6b   : > { %937 = vmatprep.subr.mxu1 %v1278_v0  ;;  %969 = vmatprep.mubr.msk.f32.mxu1 %vm1279_vm0, %v1278_v0  ;;  %v388_v6 = vld [vmem:[#allocation5 + $0x58] sm:$0xff]  ;;  %v485_v7 = vld [vmem:[#allocation7 + $0x70] sm:$0xff]  ;;  %v484_v8 = vld [vmem:[#allocation7 + $0x68] sm:$0xff]  ;;  %s701_s15 = sshll.u32 %s368_s14, 4  ;;  %s714_s18 = sshll.u32 %s375_s20, 4  ;;  %s1528_s15 = int_to_ptr.vmem [resolvable:$true] %s701_s15  ;;  %s1535_s18 = int_to_ptr.vmem [resolvable:$true] %s714_s18 }
  0x6c   : > { %903 = vmatpush3.msra.mxu0 %v392_v1  ;;  %938 = vmatpush3.msra.mxu1 %v486_v5  ;;  %v387_v9 = vld [vmem:[#allocation5 + $0x50] sm:$0xff]  ;;  %v483_v10 = vld [vmem:[#allocation7 + $0x60] sm:$0xff]  ;;  %v386_v11 = vld [vmem:[#allocation5 + $0x48] sm:$0xff]  ;;  %s1533_s13 = scalar_lea.hbm %s1607_s8, %s864_s10  ;;  %s683_s17 = scalar_lea.sflag [#allocation4], %s1453_s1 }
  0x6d   : > { %904 = vmatprep.subr.mxu0 %v1278_v0  ;;  %939 = vmatprep.subr.mxu1 %v1278_v0  ;;  %v482_v12 = vld [vmem:[#allocation7 + $0x58] sm:$0xff]  ;;  %v385_v13 = vld [vmem:[#allocation5 + $0x40] sm:$0xff]  ;;  %v481_v14 = vld [vmem:[#allocation7 + $0x50] sm:$0xff]  ;;  %s1166_s19 = scalar_lea.vmem %s1528_s15, 128  ;;  %p1631_p6 = scmp.ne.s32.totalorder %s1623_s26, 0 }
  0x6e   : > { %905 = vmatpush3.msra.mxu0 %v391_v2  ;;  %940 = vmatpush3.msra.mxu1 %v485_v7  ;;  %v384_v15 = vld [vmem:[#allocation5 + $0x38] sm:$0xff]  ;;  %v480_v16 = vld [vmem:[#allocation7 + $0x48] sm:$0xff]  ;;  %v383_v17 = vld [vmem:[#allocation5 + $0x30] sm:$0xff]  ;;  %p1167_p4 = scmp.ne.s32.totalorder %s1528_s15, %s1166_s19  ;;  %s1280_s21 = smov [#allocation10]  }
  0x6f   : > { %906 = vmatprep.subr.mxu0 %v1278_v0  ;;  %941 = vmatprep.subr.mxu1 %v1278_v0  ;;  %v479_v18 = vld [vmem:[#allocation7 + $0x40] sm:$0xff]  ;;  %v382_v19 = vld [vmem:[#allocation5 + $0x28] sm:$0xff]  ;;  %v478_v20 = vld [vmem:[#allocation7 + $0x38] sm:$0xff]  ;;  %s1170_s23 = sshll.u32 %s1280_s21, 4  ;;  %s1171_s23 = int_to_ptr.vmem [resolvable:$false] %s1170_s23 }
  0x70   : > { %907 = vmatpush3.msra.mxu0 %v390_v3  ;;  %942 = vmatpush3.msra.mxu1 %v484_v8  ;;  %v381_v21 = vld [vmem:[#allocation5 + $0x20] sm:$0xff]  ;;  %v477_v22 = vld [vmem:[#allocation7 + $0x30] sm:$0xff]  ;;  %v380_v23 = vld [vmem:[#allocation5 + $0x18] sm:$0xff]  ;;  %p1168_p12 = pnand %p1167_p4, %p1631_p6  ;;  %s1172_s16 = scalar_lea.vmem %s1171_s23, 256 }
  0x71   : > { %908 = vmatprep.subr.mxu0 %v1278_v0  ;;  %943 = vmatprep.subr.mxu1 %v1278_v0  ;;  %v476_v24 = vld [vmem:[#allocation7 + $0x28] sm:$0xff]  ;;  %v379_v25 = vld [vmem:[#allocation5 + $0x10] sm:$0xff]  ;;  %v475_v26 = vld [vmem:[#allocation7 + $0x20] sm:$0xff]  ;;  %p1173_p5 = scmp.lt.s32.totalorder %s1528_s15, %s1171_s23  ;;  %p1174_p3 = scmp.lt.s32.totalorder %s1172_s16, %s1166_s19 }
  0x72   : > { %909 = vmatpush3.msra.mxu0 %v389_v4  ;;  %944 = vmatpush3.msra.mxu1 %v483_v10  ;;  %v378_v27 = vld [vmem:[#allocation5 + $0x8] sm:$0xff]  ;;  %v474_v28 = vld [vmem:[#allocation7 + $0x18] sm:$0xff]  ;;  %v377_v29 = vld [vmem:[#allocation5] sm:$0xff]  ;;  %p1169_p0 = pneg %p1168_p12 }
  0x73   : > { %910 = vmatprep.subr.mxu0 %v1278_v0  ;;  %945 = vmatprep.subr.mxu1 %v1278_v0  ;;  %v376_v30 = vld [vmem:[%s326_s5] sm:$0xff]  ;;  %v472_v32 = vld [vmem:[#allocation7 + $0x8] sm:$0xff]  ;;  %v471_v33 = vld [vmem:[#allocation7] sm:$0xff]  ;;  %s1526_s5 = scalar_lea.hbm %s1606_s7, %s864_s10  ;;  %p1175_p7 = por %p1174_p3, %p1173_p5 }
  0x74   : > { %911 = vmatpush3.msra.mxu0 %v388_v6  ;;  %946 = vmatpush3.msra.mxu1 %v482_v12  ;;  %v473_v31 = vld [vmem:[#allocation7 + $0x10] sm:$0xff]  ;;  %v596_v34 = vld [vmem:[#allocation8 + $0xf8] sm:$0xff]  ;;  %v594_v36 = vld [vmem:[#allocation8 + $0xe8] sm:$0xff]  ;;  %v599_v12 = vlaneseq }
  0x75   : > { %912 = vmatprep.subr.mxu0 %v1278_v0  ;;  %947 = vmatprep.subr.mxu1 %v1278_v0  ;;  %v595_v35 = vld [vmem:[#allocation8 + $0xf0] sm:$0xff]  ;;  %v593_v37 = vld [vmem:[#allocation8 + $0xe0] sm:$0xff]  ;;  %v592_v38 = vld [vmem:[#allocation8 + $0xd8] sm:$0xff]  ;;  %p1176_p9 = pnand %p1175_p7, %p1169_p0 }
  0x76   : > { %913 = vmatpush3.msra.mxu0 %v387_v9  ;;  %948 = vmatpush3.msra.mxu1 %v481_v14  ;;  %v591_v39 = vld [vmem:[#allocation8 + $0xd0] sm:$0xff]  ;;  %v590_v40 = vld [vmem:[#allocation8 + $0xc8] sm:$0xff]  ;;  %v589_v41 = vld [vmem:[#allocation8 + $0xc0] sm:$0xff] }
  0x77   : > { %914 = vmatprep.subr.mxu0 %v1278_v0  ;;  %949 = vmatprep.subr.mxu1 %v1278_v0  ;;  %v588_v42 = vld [vmem:[#allocation8 + $0xb8] sm:$0xff]  ;;  %v587_v43 = vld [vmem:[#allocation8 + $0xb0] sm:$0xff]  ;;  %v586_v44 = vld [vmem:[#allocation8 + $0xa8] sm:$0xff] }
  0x78   : > { %915 = vmatpush3.msra.mxu0 %v386_v11  ;;  %950 = vmatpush3.msra.mxu1 %v480_v16  ;;  %v585_v45 = vld [vmem:[#allocation8 + $0xa0] sm:$0xff]  ;;  %v584_v46 = vld [vmem:[#allocation8 + $0x98] sm:$0xff]  ;;  %v583_v47 = vld [vmem:[#allocation8 + $0x90] sm:$0xff] }
  0x79   : > { %916 = vmatprep.subr.mxu0 %v1278_v0  ;;  %951 = vmatprep.subr.mxu1 %v1278_v0  ;;  %v582_v48 = vld [vmem:[#allocation8 + $0x88] sm:$0xff]  ;;  %v581_v49 = vld [vmem:[#allocation8 + $0x80] sm:$0xff]  ;;  %v580_v50 = vld [vmem:[#allocation8 + $0x78] sm:$0xff] }
  0x7a   : > { %917 = vmatpush3.msra.mxu0 %v385_v13  ;;  %952 = vmatpush3.msra.mxu1 %v479_v18  ;;  %v579_v51 = vld [vmem:[#allocation8 + $0x70] sm:$0xff]  ;;  %v578_v52 = vld [vmem:[#allocation8 + $0x68] sm:$0xff]  ;;  %v577_v53 = vld [vmem:[#allocation8 + $0x60] sm:$0xff]  ;;  %v600_v13 = vshrl.u32 %v599_v12, 7 }
  0x7b   : > { %918 = vmatprep.subr.mxu0 %v1278_v0  ;;  %953 = vmatprep.subr.mxu1 %v1278_v0  ;;  %v576_v54 = vld [vmem:[#allocation8 + $0x58] sm:$0xff]  ;;  %v575_v55 = vld [vmem:[#allocation8 + $0x50] sm:$0xff]  ;;  %v574_v56 = vld [vmem:[#allocation8 + $0x48] sm:$0xff] }
  0x7c   : > { %919 = vmatpush3.msra.mxu0 %v384_v15  ;;  %954 = vmatpush3.msra.mxu1 %v478_v20  ;;  %v573_v57 = vld [vmem:[#allocation8 + $0x40] sm:$0xff]  ;;  %v572_v58 = vld [vmem:[#allocation8 + $0x38] sm:$0xff]  ;;  %v571_v59 = vld [vmem:[#allocation8 + $0x30] sm:$0xff]  ;;  %v601_v14 = vsub.s32 0, %v600_v13  ;;  %v605_v16 = vsub.s32 1, %v600_v13 }
  0x7d   : > { %920 = vmatprep.subr.mxu0 %v1278_v0  ;;  %955 = vmatprep.subr.mxu1 %v1278_v0  ;;  %v570_v60 = vld [vmem:[#allocation8 + $0x28] sm:$0xff]  ;;  %v860_v61 = vld [vmem:[%s1601_s2] ss:$0 sm:$0xff]  ;;  %v569_v2 = vld [vmem:[#allocation8 + $0x20] sm:$0xff] }
  0x7e   : > { %921 = vmatpush3.msra.mxu0 %v383_v17  ;;  %956 = vmatpush3.msra.mxu1 %v477_v22  ;;  %v568_v3 = vld [vmem:[#allocation8 + $0x18] sm:$0xff]  ;;  %v567_v4 = vld [vmem:[#allocation8 + $0x10] sm:$0xff]  ;;  %v566_v5 = vld [vmem:[#allocation8 + $0x8] sm:$0xff] }
  0x7f   : > { %922 = vmatprep.subr.mxu0 %v1278_v0  ;;  %957 = vmatprep.subr.mxu1 %v1278_v0  ;;  %v565_v6 = vld [vmem:[#allocation8] sm:$0xff]  ;;  %v861_v7 = vld [vmem:[%s1603_s4] ss:$0 sm:$0xff] }
  0x80   : > { %923 = vmatpush3.msra.mxu0 %v382_v19  ;;  %958 = vmatpush3.msra.mxu1 %v476_v24  ;;  %v597_v15 = vld [vmem:[%s1605_s6] sm:$0x3] }
  0x81   : > { %924 = vmatprep.subr.mxu0 %v1278_v0  ;;  %959 = vmatprep.subr.mxu1 %v1278_v0  ;;  %v602_v17 = vrot.slane %v597_v15, %v601_v14  ;;  %v606_v18 = vrot.slane %v597_v15, %v605_v16 }
  0x82   : > { %925 = vmatpush3.msra.mxu0 %v381_v21  ;;  %960 = vmatpush3.msra.mxu1 %v475_v26 }
  0x83   : > { %926 = vmatprep.subr.mxu0 %v1278_v0  ;;  %961 = vmatprep.subr.mxu1 %v1278_v0 }
  0x84   : > { %927 = vmatpush3.msra.mxu0 %v380_v23  ;;  %962 = vmatpush3.msra.mxu1 %v474_v28 }
  0x85   : > { %928 = vmatprep.subr.mxu0 %v1278_v0  ;;  %963 = vmatprep.subr.mxu1 %v1278_v0 }
  0x86   : > { %929 = vmatpush3.msra.mxu0 %v379_v25  ;;  %964 = vmatpush3.msra.mxu1 %v473_v31 }
  0x87   : > { %930 = vmatprep.subr.mxu0 %v1278_v0  ;;  %965 = vmatprep.subr.mxu1 %v1278_v0 }
  0x88   : > { %931 = vmatpush3.msra.mxu0 %v378_v27  ;;  %966 = vmatpush3.msra.mxu1 %v472_v32 }
  0x89   : > { %932 = vmatprep.subr.mxu0 %v1278_v0  ;;  %967 = vmatprep.subr.mxu1 %v1278_v0 }
  0x8a   : > { %933 = vmatpush3.msra.mxu0 %v377_v29  ;;  %968 = vmatpush3.msra.mxu1 %v471_v33 }
  0x8b   : > { %935 = vmatmul.mubr.f32.vlgmr.msra.gmra.mxu0 %v376_v30  ;;  %609 = vmatprep.subr.mxu0 %v596_v34 }
  0x8c   : > { %673 = vmatprep.mubr.f32.mxu0 %v1278_v0  ;;  %610 = vmatpush1.msra.mxu0 %v595_v35 }
  0x8d   : > { %611 = vmatprep.subr.mxu0 %v594_v36 }
  0x8e   : > { %612 = vmatpush1.msra.mxu0 %v593_v37 }
  0x8f   : > { %613 = vmatprep.subr.mxu0 %v592_v38 }
  0x90   : > { %614 = vmatpush1.msra.mxu0 %v591_v39 }
  0x91   : > { %615 = vmatprep.subr.mxu0 %v590_v40 }
  0x92   : > { %616 = vmatpush1.msra.mxu0 %v589_v41 }
  0x93   : > { %617 = vmatprep.subr.mxu0 %v588_v42 }
  0x94   : > { %618 = vmatpush1.msra.mxu0 %v587_v43 }
  0x95   : > { %619 = vmatprep.subr.mxu0 %v586_v44 }
  0x96   : > { %620 = vmatpush1.msra.mxu0 %v585_v45 }
  0x97   : > { %621 = vmatprep.subr.mxu0 %v584_v46 }
  0x98   : > { %622 = vmatpush1.msra.mxu0 %v583_v47 }
  0x99   : > { %623 = vmatprep.subr.mxu0 %v582_v48 }
  0x9a   : > { %624 = vmatpush1.msra.mxu0 %v581_v49 }
  0x9b   : > { %625 = vmatprep.subr.mxu0 %v580_v50 }
  0x9c   : > { %626 = vmatpush1.msra.mxu0 %v579_v51 }
  0x9d   : > { %627 = vmatprep.subr.mxu0 %v578_v52 }
  0x9e   : > { %628 = vmatpush1.msra.mxu0 %v577_v53 }
  0x9f   : > { %629 = vmatprep.subr.mxu0 %v576_v54 }
  0xa0   : > { %630 = vmatpush1.msra.mxu0 %v575_v55 }
  0xa1   : > { %631 = vmatprep.subr.mxu0 %v574_v56 }
  0xa2   : > { %632 = vmatpush1.msra.mxu0 %v573_v57 }
  0xa3   : > { %633 = vmatprep.subr.mxu0 %v572_v58 }
  0xa4   : > { %634 = vmatpush1.msra.mxu0 %v571_v59 }
  0xa5   : > { %635 = vmatprep.subr.mxu0 %v570_v60 }
  0xa6   : > { %636 = vmatpush1.msra.mxu0 %v569_v2 }
  0xa7   : > { %637 = vmatprep.subr.mxu0 %v568_v3 }
  0xa8   : > { %638 = vmatpush1.msra.mxu0 %v567_v4 }
  0xa9   : > { %639 = vmatprep.subr.mxu0 %v566_v5 }
  0xaa   : > { %640 = vmatpush1.msra.mxu0 %v565_v6 }
 0x14b   : > { %v466_v62 = vpop.f32.mrf.mxu0 }
 0x14c   : > { %v467_v63 = vadd.f32 %v860_v61, %v466_v62 }
 0x14d   : > { %v936_v0 = vpop.f32.mrf.mxu0 }
 0x14e   : > { %v470_v1 = vmax.f32 %v467_v63, 0.0 }
 0x150   : > { %970 = vmatmul.mubr.f32.vlgmr.msra.gmra.mxu1 %v470_v1 }
 0x210   : > { %v560_v8 = vpop.f32.mrf.mxu1 }
 0x211   : > { %v561_v9 = vadd.f32 %v861_v7, %v560_v8 }
 0x212   : > { %v971_v10 = vpop.f32.mrf.mxu1 }
 0x213   : > { %v564_v11 = vmax.f32 %v561_v9, 0.0 }
 0x215   : > { %674 = vmatmul.mubr.f32.vlgmr.msra.gmra.mxu0 %v564_v11 }
 0x2d5   : > { %v675_v19 = vpop.f32.mrf.mxu0 }
 0x2d6   : > { %v676_v20 = vadd.f32 %v675_v19, %v602_v17 }
 0x2d7   : > { %v677_v21 = vpop.f32.mrf.mxu0 }
 0x2d8   : > { %680 = vst [vmem:[%s368_s14] sm:$0xff] %v676_v20  ;;  %v678_v22 = vadd.f32 %v677_v21, %v606_v18 }
 0x2d9   : > { %1179 = shalt.err (!%p1176_p9)
}
 0x2da   : > { %s1180_s10 = scalar_lea.hbm %s1526_s5, 128  ;;  %s1184_s9 = scalar_lea.hbm %s1606_s7, 256 }
 0x2db   : > { %p1181_p13 = scmp.ne.s32.totalorder %s1526_s5, %s1180_s10  ;;  %p1185_p11 = scmp.lt.s32.totalorder %s1526_s5, %s1606_s7 }
 0x2dc   : > { %p1186_p1 = scmp.lt.s32.totalorder %s1184_s9, %s1180_s10 }
 0x2dd   : > { %p1182_p10 = pnand %p1181_p13, %p1631_p6 }
 0x2de   : > { %p1187_p2 = por %p1186_p1, %p1185_p11 }
 0x2df   : > { %p1183_p8 = pneg %p1182_p10 }
 0x2e1   : > { %p1188_p4 = pnand %p1187_p2, %p1183_p8 }
 0x2e3   : > { %1191 = shalt.err (!%p1188_p4)
}
 0x2e4   : > { %986 = dma.vmem_to_hbm [thread:$0]  (%p1631_p6), %s1528_s15, 128, %s1526_s5, %s683_s17   ;;  %681 = vst [vmem:[%s375_s20] sm:$0xff] %v678_v22 }
 0x2e5   : > { %s688_s19 = scalar_lea.sflag [#allocation12], %s1453_s1  ;;  %s1192_s23 = scalar_lea.vmem %s1535_s18, 128 }
 0x2e6   : > { %p1193_p12 = scmp.ne.s32.totalorder %s1535_s18, %s1192_s23  ;;  %s1281_s16 = smov [#allocation11]  }
 0x2e7   : > { %s1196_s10 = sshll.u32 %s1281_s16, 4  ;;  %s1197_s10 = int_to_ptr.vmem [resolvable:$false] %s1196_s10 }
 0x2e8   : > { %p1194_p0 = pnand %p1193_p12, %p1631_p6  ;;  %s1198_s14 = scalar_lea.vmem %s1197_s10, 256 }
 0x2e9   : > { %p1199_p3 = scmp.lt.s32.totalorder %s1535_s18, %s1197_s10  ;;  %p1200_p7 = scmp.lt.s32.totalorder %s1198_s14, %s1192_s23 }
 0x2ea   : > { %p1195_p5 = pneg %p1194_p0 }
 0x2eb   : > { %p1201_p9 = por %p1200_p7, %p1199_p3 }
 0x2ed   : > { %p1202_p13 = pnand %p1201_p9, %p1195_p5 }
 0x2ef   : > { %1205 = shalt.err (!%p1202_p13)
}
 0x2f0   : > { %s1206_s24 = scalar_lea.hbm %s1533_s13, 128  ;;  %s1210_s20 = scalar_lea.hbm %s1607_s8, 256 }
 0x2f1   : > { %p1207_p10 = scmp.ne.s32.totalorder %s1533_s13, %s1206_s24  ;;  %p1211_p1 = scmp.lt.s32.totalorder %s1533_s13, %s1607_s8 }
 0x2f2   : > { %p1212_p2 = scmp.lt.s32.totalorder %s1210_s20, %s1206_s24 }
 0x2f3   : > { %p1208_p8 = pnand %p1207_p10, %p1631_p6 }
 0x2f4   : > { %p1213_p4 = por %p1212_p2, %p1211_p1 }
 0x2f5   : > { %p1209_p11 = pneg %p1208_p8 }
 0x2f7   : > { %p1214_p12 = pnand %p1213_p4, %p1209_p11 }
 0x2f9   : > { %1217 = shalt.err (!%p1214_p12)
}
 0x2fa   : > { %987 = dma.vmem_to_hbm [thread:$0]  (%p1631_p6), %s1535_s18, 128, %s1533_s13, %s688_s19  }
 0x2fb PF: > { %s726_s3 = sand.u32 1, %s1256_s27   ;;  %p1632_p0 = scmp.ne.s32.totalorder %s1616_s12, 0 }
 0x2fc   : > { %p1633_p5 = scmp.ge.s32.totalorder %s1268_s30, 2  ;;  %s727_s9 = scalar_lea.sflag [#allocation4], %s726_s3 }
 0x2fe   : > { %p1005_p3 = pnand %p1633_p5, %p1632_p0 }
 0x300   : > { %p1006_p7 = pneg %p1005_p3 }
 0x302   : > { %1247 = dma.done.wait (%p1006_p7), %s727_s9, 128  }
 0x303   : > { %1249 = vsyncadd (%p1006_p7), %s727_s9, 4294967168  ;;  %s736_s11 = scalar_lea.sflag [#allocation12], %s726_s3 }
 0x304   : > { %1251 = dma.done.wait (%p1006_p7), %s736_s11, 128  }
 0x305   : > { %1253 = vsyncadd (%p1006_p7), %s736_s11, 4294967168  ;;  %p27_p6 = scmp.ge.s32.totalorder %s1407_s22, 4   ;;  %s1634_s27 = smov %s1260_s28 }
 0x306   : > { %s1635_s28 = smov %s1264_s29  ;;  %s1636_s29 = smov %s1417_s25 }
 0x307   : > { %s1637_s30 = smov %s1407_s22  ;;  %29 = sbr.rel (!%p27_p6) target bundleno = 13 (0xd), region = 122 }
 0x30c   :  { %741 = vsyncpa [#allocation3], 1 }
 0x30d   :  { %743 = vsyncpa [#allocation3 + $0x1], 1 }
 0x30e   :  { %744 = vsyncpa [#allocation6], 1 }
 0x30f   :  { %745 = vsyncpa [#allocation9], 1 }
 0x310   :  { %746 = vsyncpa [#allocation4], 1 }
 0x311   :  { %748 = vsyncpa [#allocation4 + $0x1], 1 }
 0x312   :  { %749 = vsyncpa [#allocation12], 1 }
 0x313   :  { %751 = vsyncpa [#allocation12 + $0x1], 1 }

</bundles_post_ra>
